<compile_context>
chip_gen: v6e
topology: v6e:2x2x1
jax: 0.10.0
libtpu: 0.0.40
codegen_flags: <defaults>
</compile_context>

<pallas_src>
import functools

import jax
import jax.numpy as jnp
from jax.experimental import pallas as pl
from jax.experimental.pallas import tpu as pltpu

# ---------------- small synthetic BERT config ----------------
VOCAB = 128
HIDDEN = 32
N_LAYERS = 2
N_HEADS = 2
HEAD_DIM = HIDDEN // N_HEADS
INTER = 64
MAX_POS = 32
TYPE_VOCAB = 2
NUM_LABELS = 3
LN_EPS = 1e-12

# lane-dense padded sizes (128-lane vregs)
HP = 128              # hidden padded
IP = 128              # intermediate padded
LP = 128              # label padded (real logits are the first NUM_LABELS lanes)
SLOT = 128            # Q / K / V each get one 128-lane slot; heads share lanes 0:2*HEAD_DIM
NEG = -1e9            # cross-batch / key-padding additive mask (underflows to 0 after exp)

B = 2
S = 8


# ---------------- in-kernel helpers ----------------
def _gelu(x):
    # TODO(synk): exact erf GELU (HF default) differs ~1e-3 from this tanh approximation.
    return 0.5 * x * (1.0 + jnp.tanh(0.7978845608028654 * (x + 0.044715 * x * x * x)))


def _layernorm(x, gamma, beta):
    # Padded lanes (>= HIDDEN) of x are exactly zero and gamma/beta are zero-padded,
    # so no lane mask is needed; variance via E[x^2] - mu^2 over the real lanes only.
    mu = jnp.sum(x, axis=-1, keepdims=True) * (1.0 / HIDDEN)
    var = jnp.sum(x * x, axis=-1, keepdims=True) * (1.0 / HIDDEN) - mu * mu
    return (x - mu) * jax.lax.rsqrt(var + LN_EPS) * gamma + beta


# ---------------- the fused model kernel (grid axis = encoder layer) ----------------
def _model_kernel(ids_ref, seg_ref, att_ref,
                  wemb_ref, pemb_ref, temb_ref, eg_ref, eb_ref,
                  wqkv_ref, bqkv_ref, wo_ref, bo_ref, ln1g_ref, ln1b_ref,
                  wi_ref, bi_ref, wf_ref, bf_ref, ln2g_ref, ln2b_ref,
                  pw_ref, pb_ref, cw_ref, cb_ref,
                  o_ref, h_ref, *, batch, seq):
    bs = batch * seq
    layer = pl.program_id(0)
    n_layers = pl.num_programs(0)
    bf16 = jnp.bfloat16

    # --- first grid step: embeddings (in-kernel one-hot gathers) + embedding LN ---
    @pl.when(layer == 0)
    def _():
        ids = ids_ref[...]                                     # [bs, 1] int32
        seg = seg_ref[...]                                     # [bs, 1] int32
        oh_word = (jax.lax.broadcasted_iota(jnp.int32, (bs, VOCAB), 1) == ids).astype(bf16)
        word = jnp.dot(oh_word, wemb_ref[...], preferred_element_type=jnp.float32)
        pos_blk = pemb_ref[0:seq, :]                           # [seq, HP] f32 (aligned slice)
        pos = jnp.concatenate([pos_blk] * batch, axis=0)       # [bs, HP]
        typ = jnp.where(seg == 0, temb_ref[0:1, :], temb_ref[1:2, :])   # [bs, HP]
        emb = word + pos + typ
        # embedding dropout: eval-mode identity
        h_ref[...] = _layernorm(emb, eg_ref[...], eb_ref[...])

    # --- block-diagonal additive attention mask, built ONCE per layer (not per b/head) ---
    att = att_ref[...]                                         # [1, bs] int32 (1 valid / 0 pad)
    row_i = jax.lax.broadcasted_iota(jnp.int32, (bs, bs), 0)
    col_i = jax.lax.broadcasted_iota(jnp.int32, (bs, bs), 1)
    blocks = []
    for b in range(batch):
        lo, hi = b * seq, (b + 1) * seq
        blocks.append((row_i >= lo) & (row_i < hi) & (col_i >= lo) & (col_i < hi))
    same_batch = functools.reduce(jnp.logical_or, blocks)
    big_mask = jnp.where(same_batch & (att > 0), 0.0, NEG)     # [bs, bs] f32

    # --- one encoder layer (all matmuls bf16 inputs, f32 accumulation) ---
    h = h_ref[...]                                             # [bs, HP] f32
    qkv = jnp.dot(h.astype(bf16), wqkv_ref[...],
                  preferred_element_type=jnp.float32) + bqkv_ref[...]      # [bs, 3*SLOT]

    ctx_heads = []
    for hd in range(N_HEADS):
        c0 = hd * HEAD_DIM
        q = qkv[:, c0:c0 + HEAD_DIM].astype(bf16)              # 1/sqrt(d) folded into wq/bq
        k = qkv[:, SLOT + c0:SLOT + c0 + HEAD_DIM].astype(bf16)
        v = qkv[:, 2 * SLOT + c0:2 * SLOT + c0 + HEAD_DIM].astype(bf16)
        s = jax.lax.dot_general(q, k, (((1,), (1,)), ((), ())),
                                preferred_element_type=jnp.float32)        # [bs, bs]
        s = s + big_mask
        s = s - jnp.max(s, axis=-1, keepdims=True)
        p = jnp.exp(s)
        p = p * pl.reciprocal(jnp.sum(p, axis=-1, keepdims=True), approx=True)
        ctx_heads.append(jnp.dot(p.astype(bf16), v,
                                 preferred_element_type=jnp.float32))      # [bs, HEAD_DIM]
    ctx = jnp.concatenate(ctx_heads, axis=1)                   # [bs, 2*HEAD_DIM]

    attn_out = jnp.dot(ctx.astype(bf16), wo_ref[...],
                       preferred_element_type=jnp.float32) + bo_ref[...]   # [bs, HP]
    # attention-output dropout: eval-mode identity
    h1 = _layernorm(attn_out + h, ln1g_ref[...], ln1b_ref[...])

    inter = _gelu(jnp.dot(h1.astype(bf16), wi_ref[...],
                          preferred_element_type=jnp.float32) + bi_ref[...])
    ffn = jnp.dot(inter.astype(bf16), wf_ref[...],
                  preferred_element_type=jnp.float32) + bf_ref[...]
    # FFN-output dropout: eval-mode identity
    h2 = _layernorm(ffn + h1, ln2g_ref[...], ln2b_ref[...])
    h_ref[...] = h2

    # --- last grid step: pooler (tanh(W h[CLS] + b)) + dropout(eval) + classifier ---
    @pl.when(layer == n_layers - 1)
    def _():
        cls = jnp.concatenate([h2[b * seq:b * seq + 1, :] for b in range(batch)], axis=0)
        pooled = jnp.tanh(jnp.dot(cls.astype(bf16), pw_ref[...],
                                  preferred_element_type=jnp.float32) + pb_ref[...])
        # TODO(synk): training-mode dropout (random mask) not implemented; eval identity.
        o_ref[...] = jnp.dot(pooled.astype(bf16), cw_ref[...],
                             preferred_element_type=jnp.float32) + cb_ref[...]


# ---------------- parameters (deterministic synthetic init, natural shapes) ----------------
def init_params(key):
    def nrm(k, shape):
        return 0.02 * jax.random.normal(k, shape, dtype=jnp.float32)

    keys = iter(jax.random.split(key, 8 + 16 * N_LAYERS))
    p = {
        "word_emb": nrm(next(keys), (VOCAB, HIDDEN)),
        "pos_emb": nrm(next(keys), (MAX_POS, HIDDEN)),
        "type_emb": nrm(next(keys), (TYPE_VOCAB, HIDDEN)),
        "emb_ln_g": jnp.ones((HIDDEN,), jnp.float32),
        "emb_ln_b": jnp.zeros((HIDDEN,), jnp.float32),
        "layers": [],
        "pool_w": nrm(next(keys), (HIDDEN, HIDDEN)),
        "pool_b": jnp.zeros((HIDDEN,), jnp.float32),
        "cls_w": nrm(next(keys), (HIDDEN, NUM_LABELS)),
        "cls_b": jnp.zeros((NUM_LABELS,), jnp.float32),
    }
    for _ in range(N_LAYERS):
        layer = {
            "wq": nrm(next(keys), (HIDDEN, HIDDEN)), "bq": jnp.zeros((HIDDEN,), jnp.float32),
            "wk": nrm(next(keys), (HIDDEN, HIDDEN)), "bk": jnp.zeros((HIDDEN,), jnp.float32),
            "wv": nrm(next(keys), (HIDDEN, HIDDEN)), "bv": jnp.zeros((HIDDEN,), jnp.float32),
            "wo": nrm(next(keys), (HIDDEN, HIDDEN)), "bo": jnp.zeros((HIDDEN,), jnp.float32),
            "ln1_g": jnp.ones((HIDDEN,), jnp.float32), "ln1_b": jnp.zeros((HIDDEN,), jnp.float32),
            "wi": nrm(next(keys), (HIDDEN, INTER)), "bi": jnp.zeros((INTER,), jnp.float32),
            "wf": nrm(next(keys), (INTER, HIDDEN)), "bf": jnp.zeros((HIDDEN,), jnp.float32),
            "ln2_g": jnp.ones((HIDDEN,), jnp.float32), "ln2_b": jnp.zeros((HIDDEN,), jnp.float32),
        }
        p["layers"].append(layer)
    return p


# ---------------- one-time packing: lane-dense, compact, layer-stacked, bf16 weights ----------------
# NOTE: all padded lanes/rows are built from jnp.zeros, so lanes >= HIDDEN stay exactly 0
# through every residual / LayerNorm in the kernel (required by _layernorm's 1/HIDDEN divisor).
def _pad2(a, rows, cols):
    return jnp.zeros((rows, cols), jnp.float32).at[:a.shape[0], :a.shape[1]].set(a)


def _pad_row(v, cols):
    return jnp.zeros((1, cols), jnp.float32).at[0, :v.shape[0]].set(v)


def pack_params(p):
    bf16 = jnp.bfloat16
    scale = 1.0 / (HEAD_DIM ** 0.5)          # folded into wq / bq at pack time

    packed = {
        "word_emb": _pad2(p["word_emb"], VOCAB, HP).astype(bf16),
        "pos_emb": _pad2(p["pos_emb"], MAX_POS, HP),              # tiny; f32 for aligned slice
        "type_emb": _pad2(p["type_emb"], TYPE_VOCAB, HP),
        "emb_ln_g": _pad_row(p["emb_ln_g"], HP),
        "emb_ln_b": _pad_row(p["emb_ln_b"], HP),
        "pool_w": _pad2(p["pool_w"], HP, HP).astype(bf16),
        "pool_b": _pad_row(p["pool_b"], HP),
        "cls_w": _pad2(p["cls_w"], HP, LP).astype(bf16),
        "cls_b": _pad_row(p["cls_b"], LP),
    }

    def stack(fn):
        return jnp.stack([fn(layer) for layer in p["layers"]])

    # compact QKV: each of Q/K/V in ONE 128-lane slot, both heads in lanes [0:2*HEAD_DIM]
    packed["wqkv"] = stack(lambda l: jnp.concatenate(
        [_pad2(l["wq"] * scale, HP, SLOT),
         _pad2(l["wk"], HP, SLOT),
         _pad2(l["wv"], HP, SLOT)], axis=1)).astype(bf16)               # [L, HP, 3*SLOT]
    packed["bqkv"] = stack(lambda l: jnp.concatenate(
        [_pad_row(l["bq"] * scale, SLOT),
         _pad_row(l["bk"], SLOT),
         _pad_row(l["bv"], SLOT)], axis=1))                             # [L, 1, 3*SLOT]
    packed["wo"] = stack(lambda l: _pad2(l["wo"], N_HEADS * HEAD_DIM, HP)).astype(bf16)
    packed["bo"] = stack(lambda l: _pad_row(l["bo"], HP))
    packed["ln1_g"] = stack(lambda l: _pad_row(l["ln1_g"], HP))
    packed["ln1_b"] = stack(lambda l: _pad_row(l["ln1_b"], HP))
    packed["wi"] = stack(lambda l: _pad2(l["wi"], HP, IP)).astype(bf16)
    packed["bi"] = stack(lambda l: _pad_row(l["bi"], IP))
    packed["wf"] = stack(lambda l: _pad2(l["wf"], IP, HP)).astype(bf16)
    packed["bf"] = stack(lambda l: _pad_row(l["bf"], HP))
    packed["ln2_g"] = stack(lambda l: _pad_row(l["ln2_g"], HP))
    packed["ln2_b"] = stack(lambda l: _pad_row(l["ln2_b"], HP))
    return packed


# ---------------- forward pass (SequenceClassfication.forward) ----------------
def forward(packed, input_ids, attention_masks, segment_ids):
    Bx, Sx = input_ids.shape
    bs = Bx * Sx

    # lengths = torch.sum(input_ids != 0, dim=-1)  (matches reference; unused downstream)
    _lengths = jnp.sum(input_ids != 0, axis=-1)

    ids_col = input_ids.reshape(bs, 1).astype(jnp.int32)
    seg_col = segment_ids.reshape(bs, 1).astype(jnp.int32)
    att_row = attention_masks.reshape(1, bs).astype(jnp.int32)

    def resident(shape):
        nd = len(shape)
        return pl.BlockSpec(shape, lambda l, nd=nd: (0,) * nd)

    def layered(shape):  # shape excludes the leading layer dim (squeezed out in-kernel)
        nd = len(shape)
        return pl.BlockSpec((None,) + shape, lambda l, nd=nd: (l,) + (0,) * nd)

    grid_spec = pltpu.PrefetchScalarGridSpec(
        num_scalar_prefetch=0,
        grid=(N_LAYERS,),
        in_specs=[
            resident((bs, 1)), resident((bs, 1)), resident((1, bs)),          # ids, seg, att
            resident((VOCAB, HP)), resident((MAX_POS, HP)), resident((TYPE_VOCAB, HP)),
            resident((1, HP)), resident((1, HP)),                             # emb LN g/b
            layered((HP, 3 * SLOT)), layered((1, 3 * SLOT)),                  # wqkv, bqkv
            layered((N_HEADS * HEAD_DIM, HP)), layered((1, HP)),              # wo, bo
            layered((1, HP)), layered((1, HP)),                               # ln1 g/b
            layered((HP, IP)), layered((1, IP)),                              # wi, bi
            layered((IP, HP)), layered((1, HP)),                              # wf, bf
            layered((1, HP)), layered((1, HP)),                               # ln2 g/b
            resident((HP, HP)), resident((1, HP)),                            # pooler
            resident((HP, LP)), resident((1, LP)),                            # classifier
        ],
        out_specs=pl.BlockSpec((Bx, LP), lambda l: (0, 0)),
        scratch_shapes=[pltpu.VMEM((bs, HP), jnp.float32)],                   # hidden state h
    )

    # TODO(synk): at real BERT sizes add a leading 'parallel' grid axis over row tiles so
    # v7x's two TensorCores are both used; layers stay 'arbitrary' (sequential dependence).
    logits_pad = pl.pallas_call(
        functools.partial(_model_kernel, batch=Bx, seq=Sx),
        out_shape=jax.ShapeDtypeStruct((Bx, LP), jnp.float32),
        grid_spec=grid_spec,
        compiler_params=pltpu.CompilerParams(
            dimension_semantics=("arbitrary",),
            vmem_limit_bytes=32 * 1024 * 1024),
    )(ids_col, seg_col, att_row,
      packed["word_emb"], packed["pos_emb"], packed["type_emb"],
      packed["emb_ln_g"], packed["emb_ln_b"],
      packed["wqkv"], packed["bqkv"], packed["wo"], packed["bo"],
      packed["ln1_g"], packed["ln1_b"],
      packed["wi"], packed["bi"], packed["wf"], packed["bf"],
      packed["ln2_g"], packed["ln2_b"],
      packed["pool_w"], packed["pool_b"], packed["cls_w"], packed["cls_b"])

    # classifier output was lane-padded to 128; slice the real logits
    return logits_pad[:, :NUM_LABELS]


if __name__ == "__main__":
    root = jax.random.PRNGKey(0)
    k_param, k_ids, k_seg = jax.random.split(root, 3)

    params = init_params(k_param)
    packed = pack_params(params)

    input_ids = jax.random.randint(k_ids, (B, S), 1, VOCAB, dtype=jnp.int32)
    # emulate padding on the last two positions of the second sequence
    input_ids = input_ids.at[1, -2:].set(0)
    attention_masks = (input_ids != 0).astype(jnp.int32)
    segment_ids = jnp.zeros((B, S), dtype=jnp.int32)

    logits = jax.jit(forward)(packed, input_ids, attention_masks, segment_ids)
    jax.block_until_ready(logits)
    assert logits.shape == (B, NUM_LABELS) and logits.dtype == jnp.float32
    assert bool(jnp.all(jnp.isfinite(logits)))
    print("KERNEL_OK")
</pallas_src>

<mosaic_0001>
module attributes {stable_mosaic.version = 11 : i64} {
  func.func @_model_kernel(%arg0: i32, %arg1: memref<16x1xi32, #tpu.memory_space<vmem>>, %arg2: memref<16x1xi32, #tpu.memory_space<vmem>>, %arg3: memref<1x16xi32, #tpu.memory_space<vmem>>, %arg4: memref<128x128xbf16, #tpu.memory_space<vmem>>, %arg5: memref<32x128xf32, #tpu.memory_space<vmem>>, %arg6: memref<2x128xf32, #tpu.memory_space<vmem>>, %arg7: memref<1x128xf32, #tpu.memory_space<vmem>>, %arg8: memref<1x128xf32, #tpu.memory_space<vmem>>, %arg9: memref<1x128x384xbf16, #tpu.memory_space<vmem>>, %arg10: memref<1x1x384xf32, #tpu.memory_space<vmem>>, %arg11: memref<1x32x128xbf16, #tpu.memory_space<vmem>>, %arg12: memref<1x1x128xf32, #tpu.memory_space<vmem>>, %arg13: memref<1x1x128xf32, #tpu.memory_space<vmem>>, %arg14: memref<1x1x128xf32, #tpu.memory_space<vmem>>, %arg15: memref<1x128x128xbf16, #tpu.memory_space<vmem>>, %arg16: memref<1x1x128xf32, #tpu.memory_space<vmem>>, %arg17: memref<1x128x128xbf16, #tpu.memory_space<vmem>>, %arg18: memref<1x1x128xf32, #tpu.memory_space<vmem>>, %arg19: memref<1x1x128xf32, #tpu.memory_space<vmem>>, %arg20: memref<1x1x128xf32, #tpu.memory_space<vmem>>, %arg21: memref<128x128xbf16, #tpu.memory_space<vmem>>, %arg22: memref<1x128xf32, #tpu.memory_space<vmem>>, %arg23: memref<128x128xbf16, #tpu.memory_space<vmem>>, %arg24: memref<1x128xf32, #tpu.memory_space<vmem>>, %arg25: memref<2x128xf32, #tpu.memory_space<vmem>>, %arg26: memref<16x128xf32, #tpu.memory_space<vmem>>) attributes {dimension_semantics = [#tpu.dimension_semantics<arbitrary>], iteration_bounds = array<i64: 2>, scalar_prefetch = 0 : i64, scratch_operands = 1 : i64, tpu.core_type = #tpu.core_type<tc>, window_params = [{pipeline_mode = #tpu.pipeline_mode<synchronous>, transform_indices = @transform_0, window_bounds = array<i64: 16, 1>}, {pipeline_mode = #tpu.pipeline_mode<synchronous>, transform_indices = @transform_1, window_bounds = array<i64: 16, 1>}, {pipeline_mode = #tpu.pipeline_mode<synchronous>, transform_indices = @transform_2, window_bounds = array<i64: 1, 16>}, {pipeline_mode = #tpu.pipeline_mode<synchronous>, transform_indices = @transform_3, window_bounds = array<i64: 128, 128>}, {pipeline_mode = #tpu.pipeline_mode<synchronous>, transform_indices = @transform_4, window_bounds = array<i64: 32, 128>}, {pipeline_mode = #tpu.pipeline_mode<synchronous>, transform_indices = @transform_5, window_bounds = array<i64: 2, 128>}, {pipeline_mode = #tpu.pipeline_mode<synchronous>, transform_indices = @transform_6, window_bounds = array<i64: 1, 128>}, {pipeline_mode = #tpu.pipeline_mode<synchronous>, transform_indices = @transform_7, window_bounds = array<i64: 1, 128>}, {transform_indices = @transform_8, window_bounds = array<i64: 1, 128, 384>}, {transform_indices = @transform_9, window_bounds = array<i64: 1, 1, 384>}, {transform_indices = @transform_10, window_bounds = array<i64: 1, 32, 128>}, {transform_indices = @transform_11, window_bounds = array<i64: 1, 1, 128>}, {transform_indices = @transform_12, window_bounds = array<i64: 1, 1, 128>}, {transform_indices = @transform_13, window_bounds = array<i64: 1, 1, 128>}, {transform_indices = @transform_14, window_bounds = array<i64: 1, 128, 128>}, {transform_indices = @transform_15, window_bounds = array<i64: 1, 1, 128>}, {transform_indices = @transform_16, window_bounds = array<i64: 1, 128, 128>}, {transform_indices = @transform_17, window_bounds = array<i64: 1, 1, 128>}, {transform_indices = @transform_18, window_bounds = array<i64: 1, 1, 128>}, {transform_indices = @transform_19, window_bounds = array<i64: 1, 1, 128>}, {pipeline_mode = #tpu.pipeline_mode<synchronous>, transform_indices = @transform_20, window_bounds = array<i64: 128, 128>}, {pipeline_mode = #tpu.pipeline_mode<synchronous>, transform_indices = @transform_21, window_bounds = array<i64: 1, 128>}, {pipeline_mode = #tpu.pipeline_mode<synchronous>, transform_indices = @transform_22, window_bounds = array<i64: 128, 128>}, {pipeline_mode = #tpu.pipeline_mode<synchronous>, transform_indices = @transform_23, window_bounds = array<i64: 1, 128>}, {pipeline_mode = #tpu.pipeline_mode<synchronous>, transform_indices = @transform_24, window_bounds = array<i64: 2, 128>}]} {
    %c0_i32 = arith.constant 0 : i32
    %0 = arith.cmpi eq, %arg0, %c0_i32 : i32
    %1 = arith.extui %0 : i1 to i32
    %c0_i32_0 = arith.constant 0 : i32
    %2 = arith.cmpi ne, %1, %c0_i32_0 : i32
    scf.if %2 {
      %c0_77 = arith.constant 0 : index
      %c0_78 = arith.constant 0 : index
      %181 = vector.load %arg1[%c0_77, %c0_78] : memref<16x1xi32, #tpu.memory_space<vmem>>, vector<16x1xi32>
      %c0_79 = arith.constant 0 : index
      %c0_80 = arith.constant 0 : index
      %182 = vector.load %arg2[%c0_79, %c0_80] : memref<16x1xi32, #tpu.memory_space<vmem>>, vector<16x1xi32>
      %183 = tpu.iota {dimensions = array<i32: 1>} : vector<16x128xi32>
      %184 = vector.broadcast %181 : vector<16x1xi32> to vector<16x128xi32>
      %185 = arith.cmpi eq, %183, %184 : vector<16x128xi32>
      %186 = arith.extui %185 : vector<16x128xi1> to vector<16x128xi32>
      %187 = arith.sitofp %186 : vector<16x128xi32> to vector<16x128xf32>
      %188 = arith.truncf %187 : vector<16x128xf32> to vector<16x128xbf16>
      %c0_81 = arith.constant 0 : index
      %c0_82 = arith.constant 0 : index
      %189 = vector.load %arg4[%c0_81, %c0_82] : memref<128x128xbf16, #tpu.memory_space<vmem>>, vector<128x128xbf16>
      %cst_83 = arith.constant dense<0.000000e+00> : vector<16x128xf32>
      %190 = tpu.matmul %188, %189, %cst_83 {dimension_numbers = #tpu.dot_dimension_numbers<[1], [0], [0], [1], [0, 0, 1, 1], [], []>} : vector<16x128xbf16>, vector<128x128xbf16>, vector<16x128xf32> -> vector<16x128xf32>
      %c0_84 = arith.constant 0 : index
      %c0_85 = arith.constant 0 : index
      %191 = vector.load %arg5[%c0_84, %c0_85] : memref<32x128xf32, #tpu.memory_space<vmem>>, vector<8x128xf32>
      %192 = tpu.concatenate %191, %191 in 0 : vector<8x128xf32>, vector<8x128xf32> -> vector<16x128xf32>
      %c0_i32_86 = arith.constant 0 : i32
      %193 = vector.broadcast %c0_i32_86 : i32 to vector<16x1xi32>
      %194 = arith.cmpi eq, %182, %193 : vector<16x1xi32>
      %c0_87 = arith.constant 0 : index
      %c0_88 = arith.constant 0 : index
      %195 = vector.load %arg6[%c0_87, %c0_88] : memref<2x128xf32, #tpu.memory_space<vmem>>, vector<1x128xf32>
      %c1 = arith.constant 1 : index
      %c0_89 = arith.constant 0 : index
      %196 = vector.load %arg6[%c1, %c0_89] : memref<2x128xf32, #tpu.memory_space<vmem>>, vector<1x128xf32>
      %197 = vector.shape_cast %194 : vector<16x1xi1> to vector<16x1xi1>
      %198 = vector.broadcast %197 : vector<16x1xi1> to vector<16x128xi1>
      %199 = vector.shape_cast %195 : vector<1x128xf32> to vector<1x128xf32>
      %200 = vector.broadcast %199 : vector<1x128xf32> to vector<16x128xf32>
      %201 = vector.shape_cast %196 : vector<1x128xf32> to vector<1x128xf32>
      %202 = vector.broadcast %201 : vector<1x128xf32> to vector<16x128xf32>
      %203 = arith.select %198, %200, %202 : vector<16x128xi1>, vector<16x128xf32>
      %204 = arith.addf %190, %192 : vector<16x128xf32>
      %205 = arith.addf %204, %203 : vector<16x128xf32>
      %c0_90 = arith.constant 0 : index
      %c0_91 = arith.constant 0 : index
      %206 = vector.load %arg7[%c0_90, %c0_91] : memref<1x128xf32, #tpu.memory_space<vmem>>, vector<1x128xf32>
      %c0_92 = arith.constant 0 : index
      %c0_93 = arith.constant 0 : index
      %207 = vector.load %arg8[%c0_92, %c0_93] : memref<1x128xf32, #tpu.memory_space<vmem>>, vector<1x128xf32>
      %cst_94 = arith.constant dense<0.000000e+00> : vector<16xf32>
      %208 = vector.multi_reduction <add>, %205, %cst_94 [1] : vector<16x128xf32> to vector<16xf32>
      %209 = vector.shape_cast %208 : vector<16xf32> to vector<16x1xf32>
      %cst_95 = arith.constant 3.125000e-02 : f32
      %210 = vector.broadcast %cst_95 : f32 to vector<16x1xf32>
      %211 = arith.mulf %209, %210 : vector<16x1xf32>
      %212 = arith.mulf %205, %205 : vector<16x128xf32>
      %cst_96 = arith.constant dense<0.000000e+00> : vector<16xf32>
      %213 = vector.multi_reduction <add>, %212, %cst_96 [1] : vector<16x128xf32> to vector<16xf32>
      %214 = vector.shape_cast %213 : vector<16xf32> to vector<16x1xf32>
      %cst_97 = arith.constant 3.125000e-02 : f32
      %215 = vector.broadcast %cst_97 : f32 to vector<16x1xf32>
      %216 = arith.mulf %214, %215 : vector<16x1xf32>
      %217 = arith.mulf %211, %211 : vector<16x1xf32>
      %218 = arith.subf %216, %217 : vector<16x1xf32>
      %219 = vector.broadcast %211 : vector<16x1xf32> to vector<16x128xf32>
      %220 = arith.subf %205, %219 : vector<16x128xf32>
      %cst_98 = arith.constant 9.99999996E-13 : f32
      %221 = vector.broadcast %cst_98 : f32 to vector<16x1xf32>
      %222 = arith.addf %218, %221 : vector<16x1xf32>
      %223 = math.rsqrt %222 : vector<16x1xf32>
      %224 = vector.broadcast %223 : vector<16x1xf32> to vector<16x128xf32>
      %225 = arith.mulf %220, %224 : vector<16x128xf32>
      %226 = vector.broadcast %206 : vector<1x128xf32> to vector<16x128xf32>
      %227 = arith.mulf %225, %226 : vector<16x128xf32>
      %228 = vector.broadcast %207 : vector<1x128xf32> to vector<16x128xf32>
      %229 = arith.addf %227, %228 : vector<16x128xf32>
      %c0_99 = arith.constant 0 : index
      %c0_100 = arith.constant 0 : index
      %230 = vector.load %arg26[%c0_99, %c0_100] : memref<16x128xf32, #tpu.memory_space<vmem>>, vector<16x128xf32>
      tpu.vector_store %arg26[%c0_99, %c0_100], %229 {strides = array<i32>} : memref<16x128xf32, #tpu.memory_space<vmem>>, vector<16x128xf32>,
    } else {
    }
    %c0 = arith.constant 0 : index
    %c0_1 = arith.constant 0 : index
    %3 = vector.load %arg3[%c0, %c0_1] : memref<1x16xi32, #tpu.memory_space<vmem>>, vector<1x16xi32>
    %4 = tpu.iota {dimensions = array<i32: 0>} : vector<16x16xi32>
    %5 = tpu.iota {dimensions = array<i32: 1>} : vector<16x16xi32>
    %c0_i32_2 = arith.constant 0 : i32
    %6 = vector.broadcast %c0_i32_2 : i32 to vector<16x16xi32>
    %7 = arith.cmpi sge, %4, %6 : vector<16x16xi32>
    %c8_i32 = arith.constant 8 : i32
    %8 = vector.broadcast %c8_i32 : i32 to vector<16x16xi32>
    %9 = arith.cmpi slt, %4, %8 : vector<16x16xi32>
    %10 = arith.andi %7, %9 : vector<16x16xi1>
    %c0_i32_3 = arith.constant 0 : i32
    %11 = vector.broadcast %c0_i32_3 : i32 to vector<16x16xi32>
    %12 = arith.cmpi sge, %5, %11 : vector<16x16xi32>
    %13 = arith.andi %10, %12 : vector<16x16xi1>
    %c8_i32_4 = arith.constant 8 : i32
    %14 = vector.broadcast %c8_i32_4 : i32 to vector<16x16xi32>
    %15 = arith.cmpi slt, %5, %14 : vector<16x16xi32>
    %16 = arith.andi %13, %15 : vector<16x16xi1>
    %c8_i32_5 = arith.constant 8 : i32
    %17 = vector.broadcast %c8_i32_5 : i32 to vector<16x16xi32>
    %18 = arith.cmpi sge, %4, %17 : vector<16x16xi32>
    %c16_i32 = arith.constant 16 : i32
    %19 = vector.broadcast %c16_i32 : i32 to vector<16x16xi32>
    %20 = arith.cmpi slt, %4, %19 : vector<16x16xi32>
    %21 = arith.andi %18, %20 : vector<16x16xi1>
    %c8_i32_6 = arith.constant 8 : i32
    %22 = vector.broadcast %c8_i32_6 : i32 to vector<16x16xi32>
    %23 = arith.cmpi sge, %5, %22 : vector<16x16xi32>
    %24 = arith.andi %21, %23 : vector<16x16xi1>
    %c16_i32_7 = arith.constant 16 : i32
    %25 = vector.broadcast %c16_i32_7 : i32 to vector<16x16xi32>
    %26 = arith.cmpi slt, %5, %25 : vector<16x16xi32>
    %27 = arith.andi %24, %26 : vector<16x16xi1>
    %28 = arith.ori %16, %27 : vector<16x16xi1>
    %c0_i32_8 = arith.constant 0 : i32
    %29 = vector.broadcast %c0_i32_8 : i32 to vector<1x16xi32>
    %30 = arith.cmpi sgt, %3, %29 : vector<1x16xi32>
    %31 = vector.broadcast %30 : vector<1x16xi1> to vector<16x16xi1>
    %32 = arith.andi %28, %31 : vector<16x16xi1>
    %cst = arith.constant 0.000000e+00 : f32
    %cst_9 = arith.constant -1.000000e+09 : f32
    %33 = vector.broadcast %cst : f32 to vector<16x16xf32>
    %34 = vector.broadcast %cst_9 : f32 to vector<16x16xf32>
    %35 = arith.select %32, %33, %34 : vector<16x16xi1>, vector<16x16xf32>
    %c0_10 = arith.constant 0 : index
    %c0_11 = arith.constant 0 : index
    %36 = vector.load %arg26[%c0_10, %c0_11] : memref<16x128xf32, #tpu.memory_space<vmem>>, vector<16x128xf32>
    %37 = arith.truncf %36 : vector<16x128xf32> to vector<16x128xbf16>
    %c0_12 = arith.constant 0 : index
    %c0_13 = arith.constant 0 : index
    %c0_14 = arith.constant 0 : index
    %38 = vector.load %arg9[%c0_12, %c0_13, %c0_14] : memref<1x128x384xbf16, #tpu.memory_space<vmem>>, vector<1x128x384xbf16>
    %39 = vector.shape_cast %38 : vector<1x128x384xbf16> to vector<128x384xbf16>
    %cst_15 = arith.constant dense<0.000000e+00> : vector<16x384xf32>
    %40 = tpu.matmul %37, %39, %cst_15 {dimension_numbers = #tpu.dot_dimension_numbers<[1], [0], [0], [1], [0, 0, 1, 1], [], []>} : vector<16x128xbf16>, vector<128x384xbf16>, vector<16x384xf32> -> vector<16x384xf32>
    %c0_16 = arith.constant 0 : index
    %c0_17 = arith.constant 0 : index
    %c0_18 = arith.constant 0 : index
    %41 = vector.load %arg10[%c0_16, %c0_17, %c0_18] : memref<1x1x384xf32, #tpu.memory_space<vmem>>, vector<1x1x384xf32>
    %42 = vector.shape_cast %41 : vector<1x1x384xf32> to vector<1x384xf32>
    %43 = vector.broadcast %42 : vector<1x384xf32> to vector<16x384xf32>
    %44 = arith.addf %40, %43 : vector<16x384xf32>
    %45 = vector.extract_strided_slice %44 {offsets = [0, 0], sizes = [16, 16], strides = [1, 1]} : vector<16x384xf32> to vector<16x16xf32>
    %46 = arith.truncf %45 : vector<16x16xf32> to vector<16x16xbf16>
    %47 = vector.extract_strided_slice %44 {offsets = [0, 128], sizes = [16, 16], strides = [1, 1]} : vector<16x384xf32> to vector<16x16xf32>
    %48 = arith.truncf %47 : vector<16x16xf32> to vector<16x16xbf16>
    %49 = vector.extract_strided_slice %44 {offsets = [0, 256], sizes = [16, 16], strides = [1, 1]} : vector<16x384xf32> to vector<16x16xf32>
    %50 = arith.truncf %49 : vector<16x16xf32> to vector<16x16xbf16>
    %cst_19 = arith.constant dense<0.000000e+00> : vector<16x16xf32>
    %51 = tpu.matmul %46, %48, %cst_19 {dimension_numbers = #tpu.dot_dimension_numbers<[1], [1], [0], [0], [0, 0, 1, 0], [], []>} : vector<16x16xbf16>, vector<16x16xbf16>, vector<16x16xf32> -> vector<16x16xf32>
    %52 = arith.addf %51, %35 : vector<16x16xf32>
    %cst_20 = arith.constant dense<0xFF800000> : vector<16xf32>
    %53 = vector.multi_reduction <maximumf>, %52, %cst_20 [1] : vector<16x16xf32> to vector<16xf32>
    %54 = vector.shape_cast %53 : vector<16xf32> to vector<16x1xf32>
    %55 = vector.broadcast %54 : vector<16x1xf32> to vector<16x16xf32>
    %56 = arith.subf %52, %55 : vector<16x16xf32>
    %57 = math.exp %56 : vector<16x16xf32>
    %cst_21 = arith.constant dense<0.000000e+00> : vector<16xf32>
    %58 = vector.multi_reduction <add>, %57, %cst_21 [1] : vector<16x16xf32> to vector<16xf32>
    %59 = vector.shape_cast %58 : vector<16xf32> to vector<16x1xf32>
    %60 = tpu.reciprocal %59 {approx = true} : vector<16x1xf32> -> vector<16x1xf32>
    %61 = vector.broadcast %60 : vector<16x1xf32> to vector<16x16xf32>
    %62 = arith.mulf %57, %61 : vector<16x16xf32>
    %63 = arith.truncf %62 : vector<16x16xf32> to vector<16x16xbf16>
    %cst_22 = arith.constant dense<0.000000e+00> : vector<16x16xf32>
    %64 = tpu.matmul %63, %50, %cst_22 {dimension_numbers = #tpu.dot_dimension_numbers<[1], [0], [0], [1], [0, 0, 1, 1], [], []>} : vector<16x16xbf16>, vector<16x16xbf16>, vector<16x16xf32> -> vector<16x16xf32>
    %65 = vector.extract_strided_slice %44 {offsets = [0, 16], sizes = [16, 16], strides = [1, 1]} : vector<16x384xf32> to vector<16x16xf32>
    %66 = arith.truncf %65 : vector<16x16xf32> to vector<16x16xbf16>
    %67 = vector.extract_strided_slice %44 {offsets = [0, 144], sizes = [16, 16], strides = [1, 1]} : vector<16x384xf32> to vector<16x16xf32>
    %68 = arith.truncf %67 : vector<16x16xf32> to vector<16x16xbf16>
    %69 = vector.extract_strided_slice %44 {offsets = [0, 272], sizes = [16, 16], strides = [1, 1]} : vector<16x384xf32> to vector<16x16xf32>
    %70 = arith.truncf %69 : vector<16x16xf32> to vector<16x16xbf16>
    %cst_23 = arith.constant dense<0.000000e+00> : vector<16x16xf32>
    %71 = tpu.matmul %66, %68, %cst_23 {dimension_numbers = #tpu.dot_dimension_numbers<[1], [1], [0], [0], [0, 0, 1, 0], [], []>} : vector<16x16xbf16>, vector<16x16xbf16>, vector<16x16xf32> -> vector<16x16xf32>
    %72 = arith.addf %71, %35 : vector<16x16xf32>
    %cst_24 = arith.constant dense<0xFF800000> : vector<16xf32>
    %73 = vector.multi_reduction <maximumf>, %72, %cst_24 [1] : vector<16x16xf32> to vector<16xf32>
    %74 = vector.shape_cast %73 : vector<16xf32> to vector<16x1xf32>
    %75 = vector.broadcast %74 : vector<16x1xf32> to vector<16x16xf32>
    %76 = arith.subf %72, %75 : vector<16x16xf32>
    %77 = math.exp %76 : vector<16x16xf32>
    %cst_25 = arith.constant dense<0.000000e+00> : vector<16xf32>
    %78 = vector.multi_reduction <add>, %77, %cst_25 [1] : vector<16x16xf32> to vector<16xf32>
    %79 = vector.shape_cast %78 : vector<16xf32> to vector<16x1xf32>
    %80 = tpu.reciprocal %79 {approx = true} : vector<16x1xf32> -> vector<16x1xf32>
    %81 = vector.broadcast %80 : vector<16x1xf32> to vector<16x16xf32>
    %82 = arith.mulf %77, %81 : vector<16x16xf32>
    %83 = arith.truncf %82 : vector<16x16xf32> to vector<16x16xbf16>
    %cst_26 = arith.constant dense<0.000000e+00> : vector<16x16xf32>
    %84 = tpu.matmul %83, %70, %cst_26 {dimension_numbers = #tpu.dot_dimension_numbers<[1], [0], [0], [1], [0, 0, 1, 1], [], []>} : vector<16x16xbf16>, vector<16x16xbf16>, vector<16x16xf32> -> vector<16x16xf32>
    %85 = tpu.concatenate %64, %84 in 1 : vector<16x16xf32>, vector<16x16xf32> -> vector<16x32xf32>
    %86 = arith.truncf %85 : vector<16x32xf32> to vector<16x32xbf16>
    %c0_27 = arith.constant 0 : index
    %c0_28 = arith.constant 0 : index
    %c0_29 = arith.constant 0 : index
    %87 = vector.load %arg11[%c0_27, %c0_28, %c0_29] : memref<1x32x128xbf16, #tpu.memory_space<vmem>>, vector<1x32x128xbf16>
    %88 = vector.shape_cast %87 : vector<1x32x128xbf16> to vector<32x128xbf16>
    %cst_30 = arith.constant dense<0.000000e+00> : vector<16x128xf32>
    %89 = tpu.matmul %86, %88, %cst_30 {dimension_numbers = #tpu.dot_dimension_numbers<[1], [0], [0], [1], [0, 0, 1, 1], [], []>} : vector<16x32xbf16>, vector<32x128xbf16>, vector<16x128xf32> -> vector<16x128xf32>
    %c0_31 = arith.constant 0 : index
    %c0_32 = arith.constant 0 : index
    %c0_33 = arith.constant 0 : index
    %90 = vector.load %arg12[%c0_31, %c0_32, %c0_33] : memref<1x1x128xf32, #tpu.memory_space<vmem>>, vector<1x1x128xf32>
    %91 = vector.shape_cast %90 : vector<1x1x128xf32> to vector<1x128xf32>
    %92 = vector.broadcast %91 : vector<1x128xf32> to vector<16x128xf32>
    %93 = arith.addf %89, %92 : vector<16x128xf32>
    %94 = arith.addf %93, %36 : vector<16x128xf32>
    %c0_34 = arith.constant 0 : index
    %c0_35 = arith.constant 0 : index
    %c0_36 = arith.constant 0 : index
    %95 = vector.load %arg13[%c0_34, %c0_35, %c0_36] : memref<1x1x128xf32, #tpu.memory_space<vmem>>, vector<1x1x128xf32>
    %96 = vector.shape_cast %95 : vector<1x1x128xf32> to vector<1x128xf32>
    %c0_37 = arith.constant 0 : index
    %c0_38 = arith.constant 0 : index
    %c0_39 = arith.constant 0 : index
    %97 = vector.load %arg14[%c0_37, %c0_38, %c0_39] : memref<1x1x128xf32, #tpu.memory_space<vmem>>, vector<1x1x128xf32>
    %98 = vector.shape_cast %97 : vector<1x1x128xf32> to vector<1x128xf32>
    %cst_40 = arith.constant dense<0.000000e+00> : vector<16xf32>
    %99 = vector.multi_reduction <add>, %94, %cst_40 [1] : vector<16x128xf32> to vector<16xf32>
    %100 = vector.shape_cast %99 : vector<16xf32> to vector<16x1xf32>
    %cst_41 = arith.constant 3.125000e-02 : f32
    %101 = vector.broadcast %cst_41 : f32 to vector<16x1xf32>
    %102 = arith.mulf %100, %101 : vector<16x1xf32>
    %103 = arith.mulf %94, %94 : vector<16x128xf32>
    %cst_42 = arith.constant dense<0.000000e+00> : vector<16xf32>
    %104 = vector.multi_reduction <add>, %103, %cst_42 [1] : vector<16x128xf32> to vector<16xf32>
    %105 = vector.shape_cast %104 : vector<16xf32> to vector<16x1xf32>
    %cst_43 = arith.constant 3.125000e-02 : f32
    %106 = vector.broadcast %cst_43 : f32 to vector<16x1xf32>
    %107 = arith.mulf %105, %106 : vector<16x1xf32>
    %108 = arith.mulf %102, %102 : vector<16x1xf32>
    %109 = arith.subf %107, %108 : vector<16x1xf32>
    %110 = vector.broadcast %102 : vector<16x1xf32> to vector<16x128xf32>
    %111 = arith.subf %94, %110 : vector<16x128xf32>
    %cst_44 = arith.constant 9.99999996E-13 : f32
    %112 = vector.broadcast %cst_44 : f32 to vector<16x1xf32>
    %113 = arith.addf %109, %112 : vector<16x1xf32>
    %114 = math.rsqrt %113 : vector<16x1xf32>
    %115 = vector.broadcast %114 : vector<16x1xf32> to vector<16x128xf32>
    %116 = arith.mulf %111, %115 : vector<16x128xf32>
    %117 = vector.broadcast %96 : vector<1x128xf32> to vector<16x128xf32>
    %118 = arith.mulf %116, %117 : vector<16x128xf32>
    %119 = vector.broadcast %98 : vector<1x128xf32> to vector<16x128xf32>
    %120 = arith.addf %118, %119 : vector<16x128xf32>
    %121 = arith.truncf %120 : vector<16x128xf32> to vector<16x128xbf16>
    %c0_45 = arith.constant 0 : index
    %c0_46 = arith.constant 0 : index
    %c0_47 = arith.constant 0 : index
    %122 = vector.load %arg15[%c0_45, %c0_46, %c0_47] : memref<1x128x128xbf16, #tpu.memory_space<vmem>>, vector<1x128x128xbf16>
    %123 = vector.shape_cast %122 : vector<1x128x128xbf16> to vector<128x128xbf16>
    %cst_48 = arith.constant dense<0.000000e+00> : vector<16x128xf32>
    %124 = tpu.matmul %121, %123, %cst_48 {dimension_numbers = #tpu.dot_dimension_numbers<[1], [0], [0], [1], [0, 0, 1, 1], [], []>} : vector<16x128xbf16>, vector<128x128xbf16>, vector<16x128xf32> -> vector<16x128xf32>
    %c0_49 = arith.constant 0 : index
    %c0_50 = arith.constant 0 : index
    %c0_51 = arith.constant 0 : index
    %125 = vector.load %arg16[%c0_49, %c0_50, %c0_51] : memref<1x1x128xf32, #tpu.memory_space<vmem>>, vector<1x1x128xf32>
    %126 = vector.shape_cast %125 : vector<1x1x128xf32> to vector<1x128xf32>
    %127 = vector.broadcast %126 : vector<1x128xf32> to vector<16x128xf32>
    %128 = arith.addf %124, %127 : vector<16x128xf32>
    %cst_52 = arith.constant 5.000000e-01 : f32
    %129 = vector.broadcast %cst_52 : f32 to vector<16x128xf32>
    %130 = arith.mulf %129, %128 : vector<16x128xf32>
    %cst_53 = arith.constant 4.471500e-02 : f32
    %131 = vector.broadcast %cst_53 : f32 to vector<16x128xf32>
    %132 = arith.mulf %131, %128 : vector<16x128xf32>
    %133 = arith.mulf %132, %128 : vector<16x128xf32>
    %134 = arith.mulf %133, %128 : vector<16x128xf32>
    %135 = arith.addf %128, %134 : vector<16x128xf32>
    %cst_54 = arith.constant 0.797884583 : f32
    %136 = vector.broadcast %cst_54 : f32 to vector<16x128xf32>
    %137 = arith.mulf %136, %135 : vector<16x128xf32>
    %138 = math.tanh %137 : vector<16x128xf32>
    %cst_55 = arith.constant 1.000000e+00 : f32
    %139 = vector.broadcast %cst_55 : f32 to vector<16x128xf32>
    %140 = arith.addf %139, %138 : vector<16x128xf32>
    %141 = arith.mulf %130, %140 : vector<16x128xf32>
    %142 = arith.truncf %141 : vector<16x128xf32> to vector<16x128xbf16>
    %c0_56 = arith.constant 0 : index
    %c0_57 = arith.constant 0 : index
    %c0_58 = arith.constant 0 : index
    %143 = vector.load %arg17[%c0_56, %c0_57, %c0_58] : memref<1x128x128xbf16, #tpu.memory_space<vmem>>, vector<1x128x128xbf16>
    %144 = vector.shape_cast %143 : vector<1x128x128xbf16> to vector<128x128xbf16>
    %cst_59 = arith.constant dense<0.000000e+00> : vector<16x128xf32>
    %145 = tpu.matmul %142, %144, %cst_59 {dimension_numbers = #tpu.dot_dimension_numbers<[1], [0], [0], [1], [0, 0, 1, 1], [], []>} : vector<16x128xbf16>, vector<128x128xbf16>, vector<16x128xf32> -> vector<16x128xf32>
    %c0_60 = arith.constant 0 : index
    %c0_61 = arith.constant 0 : index
    %c0_62 = arith.constant 0 : index
    %146 = vector.load %arg18[%c0_60, %c0_61, %c0_62] : memref<1x1x128xf32, #tpu.memory_space<vmem>>, vector<1x1x128xf32>
    %147 = vector.shape_cast %146 : vector<1x1x128xf32> to vector<1x128xf32>
    %148 = vector.broadcast %147 : vector<1x128xf32> to vector<16x128xf32>
    %149 = arith.addf %145, %148 : vector<16x128xf32>
    %150 = arith.addf %149, %120 : vector<16x128xf32>
    %c0_63 = arith.constant 0 : index
    %c0_64 = arith.constant 0 : index
    %c0_65 = arith.constant 0 : index
    %151 = vector.load %arg19[%c0_63, %c0_64, %c0_65] : memref<1x1x128xf32, #tpu.memory_space<vmem>>, vector<1x1x128xf32>
    %152 = vector.shape_cast %151 : vector<1x1x128xf32> to vector<1x128xf32>
    %c0_66 = arith.constant 0 : index
    %c0_67 = arith.constant 0 : index
    %c0_68 = arith.constant 0 : index
    %153 = vector.load %arg20[%c0_66, %c0_67, %c0_68] : memref<1x1x128xf32, #tpu.memory_space<vmem>>, vector<1x1x128xf32>
    %154 = vector.shape_cast %153 : vector<1x1x128xf32> to vector<1x128xf32>
    %cst_69 = arith.constant dense<0.000000e+00> : vector<16xf32>
    %155 = vector.multi_reduction <add>, %150, %cst_69 [1] : vector<16x128xf32> to vector<16xf32>
    %156 = vector.shape_cast %155 : vector<16xf32> to vector<16x1xf32>
    %cst_70 = arith.constant 3.125000e-02 : f32
    %157 = vector.broadcast %cst_70 : f32 to vector<16x1xf32>
    %158 = arith.mulf %156, %157 : vector<16x1xf32>
    %159 = arith.mulf %150, %150 : vector<16x128xf32>
    %cst_71 = arith.constant dense<0.000000e+00> : vector<16xf32>
    %160 = vector.multi_reduction <add>, %159, %cst_71 [1] : vector<16x128xf32> to vector<16xf32>
    %161 = vector.shape_cast %160 : vector<16xf32> to vector<16x1xf32>
    %cst_72 = arith.constant 3.125000e-02 : f32
    %162 = vector.broadcast %cst_72 : f32 to vector<16x1xf32>
    %163 = arith.mulf %161, %162 : vector<16x1xf32>
    %164 = arith.mulf %158, %158 : vector<16x1xf32>
    %165 = arith.subf %163, %164 : vector<16x1xf32>
    %166 = vector.broadcast %158 : vector<16x1xf32> to vector<16x128xf32>
    %167 = arith.subf %150, %166 : vector<16x128xf32>
    %cst_73 = arith.constant 9.99999996E-13 : f32
    %168 = vector.broadcast %cst_73 : f32 to vector<16x1xf32>
    %169 = arith.addf %165, %168 : vector<16x1xf32>
    %170 = math.rsqrt %169 : vector<16x1xf32>
    %171 = vector.broadcast %170 : vector<16x1xf32> to vector<16x128xf32>
    %172 = arith.mulf %167, %171 : vector<16x128xf32>
    %173 = vector.broadcast %152 : vector<1x128xf32> to vector<16x128xf32>
    %174 = arith.mulf %172, %173 : vector<16x128xf32>
    %175 = vector.broadcast %154 : vector<1x128xf32> to vector<16x128xf32>
    %176 = arith.addf %174, %175 : vector<16x128xf32>
    %c0_74 = arith.constant 0 : index
    %c0_75 = arith.constant 0 : index
    %177 = vector.load %arg26[%c0_74, %c0_75] : memref<16x128xf32, #tpu.memory_space<vmem>>, vector<16x128xf32>
    tpu.vector_store %arg26[%c0_74, %c0_75], %176 {strides = array<i32>} : memref<16x128xf32, #tpu.memory_space<vmem>>, vector<16x128xf32>,
    %c1_i32 = arith.constant 1 : i32
    %178 = arith.cmpi eq, %arg0, %c1_i32 : i32
    %179 = arith.extui %178 : i1 to i32
    %c0_i32_76 = arith.constant 0 : i32
    %180 = arith.cmpi ne, %179, %c0_i32_76 : i32
    scf.if %180 {
      %181 = vector.extract_strided_slice %176 {offsets = [0, 0], sizes = [1, 128], strides = [1, 1]} : vector<16x128xf32> to vector<1x128xf32>
      %182 = vector.extract_strided_slice %176 {offsets = [8, 0], sizes = [1, 128], strides = [1, 1]} : vector<16x128xf32> to vector<1x128xf32>
      %183 = tpu.concatenate %181, %182 in 0 : vector<1x128xf32>, vector<1x128xf32> -> vector<2x128xf32>
      %184 = arith.truncf %183 : vector<2x128xf32> to vector<2x128xbf16>
      %c0_77 = arith.constant 0 : index
      %c0_78 = arith.constant 0 : index
      %185 = vector.load %arg21[%c0_77, %c0_78] : memref<128x128xbf16, #tpu.memory_space<vmem>>, vector<128x128xbf16>
      %cst_79 = arith.constant dense<0.000000e+00> : vector<2x128xf32>
      %186 = tpu.matmul %184, %185, %cst_79 {dimension_numbers = #tpu.dot_dimension_numbers<[1], [0], [0], [1], [0, 0, 1, 1], [], []>} : vector<2x128xbf16>, vector<128x128xbf16>, vector<2x128xf32> -> vector<2x128xf32>
      %c0_80 = arith.constant 0 : index
      %c0_81 = arith.constant 0 : index
      %187 = vector.load %arg22[%c0_80, %c0_81] : memref<1x128xf32, #tpu.memory_space<vmem>>, vector<1x128xf32>
      %188 = vector.broadcast %187 : vector<1x128xf32> to vector<2x128xf32>
      %189 = arith.addf %186, %188 : vector<2x128xf32>
      %190 = math.tanh %189 : vector<2x128xf32>
      %191 = arith.truncf %190 : vector<2x128xf32> to vector<2x128xbf16>
      %c0_82 = arith.constant 0 : index
      %c0_83 = arith.constant 0 : index
      %192 = vector.load %arg23[%c0_82, %c0_83] : memref<128x128xbf16, #tpu.memory_space<vmem>>, vector<128x128xbf16>
      %cst_84 = arith.constant dense<0.000000e+00> : vector<2x128xf32>
      %193 = tpu.matmul %191, %192, %cst_84 {dimension_numbers = #tpu.dot_dimension_numbers<[1], [0], [0], [1], [0, 0, 1, 1], [], []>} : vector<2x128xbf16>, vector<128x128xbf16>, vector<2x128xf32> -> vector<2x128xf32>
      %c0_85 = arith.constant 0 : index
      %c0_86 = arith.constant 0 : index
      %194 = vector.load %arg24[%c0_85, %c0_86] : memref<1x128xf32, #tpu.memory_space<vmem>>, vector<1x128xf32>
      %195 = vector.broadcast %194 : vector<1x128xf32> to vector<2x128xf32>
      %196 = arith.addf %193, %195 : vector<2x128xf32>
      %c0_87 = arith.constant 0 : index
      %c0_88 = arith.constant 0 : index
      %197 = vector.load %arg25[%c0_87, %c0_88] : memref<2x128xf32, #tpu.memory_space<vmem>>, vector<2x128xf32>
      tpu.vector_store %arg25[%c0_87, %c0_88], %196 {strides = array<i32>} : memref<2x128xf32, #tpu.memory_space<vmem>>, vector<2x128xf32>,
    } else {
    }
    return
  }
  func.func @transform_0(%arg0: i32) -> (i32, i32) {
    %c0_i32 = arith.constant 0 : i32
    %c0_i32_0 = arith.constant 0 : i32
    %c0_i32_1 = arith.constant 0 : i32
    return %c0_i32, %c0_i32_0 : i32, i32
  }
  func.func @transform_1(%arg0: i32) -> (i32, i32) {
    %c0_i32 = arith.constant 0 : i32
    %c0_i32_0 = arith.constant 0 : i32
    %c0_i32_1 = arith.constant 0 : i32
    return %c0_i32, %c0_i32_0 : i32, i32
  }
  func.func @transform_2(%arg0: i32) -> (i32, i32) {
    %c0_i32 = arith.constant 0 : i32
    %c0_i32_0 = arith.constant 0 : i32
    %c0_i32_1 = arith.constant 0 : i32
    return %c0_i32, %c0_i32_0 : i32, i32
  }
  func.func @transform_3(%arg0: i32) -> (i32, i32) {
    %c0_i32 = arith.constant 0 : i32
    %c0_i32_0 = arith.constant 0 : i32
    %c0_i32_1 = arith.constant 0 : i32
    return %c0_i32, %c0_i32_0 : i32, i32
  }
  func.func @transform_4(%arg0: i32) -> (i32, i32) {
    %c0_i32 = arith.constant 0 : i32
    %c0_i32_0 = arith.constant 0 : i32
    %c0_i32_1 = arith.constant 0 : i32
    return %c0_i32, %c0_i32_0 : i32, i32
  }
  func.func @transform_5(%arg0: i32) -> (i32, i32) {
    %c0_i32 = arith.constant 0 : i32
    %c0_i32_0 = arith.constant 0 : i32
    %c0_i32_1 = arith.constant 0 : i32
    return %c0_i32, %c0_i32_0 : i32, i32
  }
  func.func @transform_6(%arg0: i32) -> (i32, i32) {
    %c0_i32 = arith.constant 0 : i32
    %c0_i32_0 = arith.constant 0 : i32
    %c0_i32_1 = arith.constant 0 : i32
    return %c0_i32, %c0_i32_0 : i32, i32
  }
  func.func @transform_7(%arg0: i32) -> (i32, i32) {
    %c0_i32 = arith.constant 0 : i32
    %c0_i32_0 = arith.constant 0 : i32
    %c0_i32_1 = arith.constant 0 : i32
    return %c0_i32, %c0_i32_0 : i32, i32
  }
  func.func @transform_8(%arg0: i32) -> (i32, i32, i32) {
    %c0_i32 = arith.constant 0 : i32
    %c0_i32_0 = arith.constant 0 : i32
    %c0_i32_1 = arith.constant 0 : i32
    return %arg0, %c0_i32, %c0_i32_0 : i32, i32, i32
  }
  func.func @transform_9(%arg0: i32) -> (i32, i32, i32) {
    %c0_i32 = arith.constant 0 : i32
    %c0_i32_0 = arith.constant 0 : i32
    %c0_i32_1 = arith.constant 0 : i32
    return %arg0, %c0_i32, %c0_i32_0 : i32, i32, i32
  }
  func.func @transform_10(%arg0: i32) -> (i32, i32, i32) {
    %c0_i32 = arith.constant 0 : i32
    %c0_i32_0 = arith.constant 0 : i32
    %c0_i32_1 = arith.constant 0 : i32
    return %arg0, %c0_i32, %c0_i32_0 : i32, i32, i32
  }
  func.func @transform_11(%arg0: i32) -> (i32, i32, i32) {
    %c0_i32 = arith.constant 0 : i32
    %c0_i32_0 = arith.constant 0 : i32
    %c0_i32_1 = arith.constant 0 : i32
    return %arg0, %c0_i32, %c0_i32_0 : i32, i32, i32
  }
  func.func @transform_12(%arg0: i32) -> (i32, i32, i32) {
    %c0_i32 = arith.constant 0 : i32
    %c0_i32_0 = arith.constant 0 : i32
    %c0_i32_1 = arith.constant 0 : i32
    return %arg0, %c0_i32, %c0_i32_0 : i32, i32, i32
  }
  func.func @transform_13(%arg0: i32) -> (i32, i32, i32) {
    %c0_i32 = arith.constant 0 : i32
    %c0_i32_0 = arith.constant 0 : i32
    %c0_i32_1 = arith.constant 0 : i32
    return %arg0, %c0_i32, %c0_i32_0 : i32, i32, i32
  }
  func.func @transform_14(%arg0: i32) -> (i32, i32, i32) {
    %c0_i32 = arith.constant 0 : i32
    %c0_i32_0 = arith.constant 0 : i32
    %c0_i32_1 = arith.constant 0 : i32
    return %arg0, %c0_i32, %c0_i32_0 : i32, i32, i32
  }
  func.func @transform_15(%arg0: i32) -> (i32, i32, i32) {
    %c0_i32 = arith.constant 0 : i32
    %c0_i32_0 = arith.constant 0 : i32
    %c0_i32_1 = arith.constant 0 : i32
    return %arg0, %c0_i32, %c0_i32_0 : i32, i32, i32
  }
  func.func @transform_16(%arg0: i32) -> (i32, i32, i32) {
    %c0_i32 = arith.constant 0 : i32
    %c0_i32_0 = arith.constant 0 : i32
    %c0_i32_1 = arith.constant 0 : i32
    return %arg0, %c0_i32, %c0_i32_0 : i32, i32, i32
  }
  func.func @transform_17(%arg0: i32) -> (i32, i32, i32) {
    %c0_i32 = arith.constant 0 : i32
    %c0_i32_0 = arith.constant 0 : i32
    %c0_i32_1 = arith.constant 0 : i32
    return %arg0, %c0_i32, %c0_i32_0 : i32, i32, i32
  }
  func.func @transform_18(%arg0: i32) -> (i32, i32, i32) {
    %c0_i32 = arith.constant 0 : i32
    %c0_i32_0 = arith.constant 0 : i32
    %c0_i32_1 = arith.constant 0 : i32
    return %arg0, %c0_i32, %c0_i32_0 : i32, i32, i32
  }
  func.func @transform_19(%arg0: i32) -> (i32, i32, i32) {
    %c0_i32 = arith.constant 0 : i32
    %c0_i32_0 = arith.constant 0 : i32
    %c0_i32_1 = arith.constant 0 : i32
    return %arg0, %c0_i32, %c0_i32_0 : i32, i32, i32
  }
  func.func @transform_20(%arg0: i32) -> (i32, i32) {
    %c0_i32 = arith.constant 0 : i32
    %c0_i32_0 = arith.constant 0 : i32
    %c0_i32_1 = arith.constant 0 : i32
    return %c0_i32, %c0_i32_0 : i32, i32
  }
  func.func @transform_21(%arg0: i32) -> (i32, i32) {
    %c0_i32 = arith.constant 0 : i32
    %c0_i32_0 = arith.constant 0 : i32
    %c0_i32_1 = arith.constant 0 : i32
    return %c0_i32, %c0_i32_0 : i32, i32
  }
  func.func @transform_22(%arg0: i32) -> (i32, i32) {
    %c0_i32 = arith.constant 0 : i32
    %c0_i32_0 = arith.constant 0 : i32
    %c0_i32_1 = arith.constant 0 : i32
    return %c0_i32, %c0_i32_0 : i32, i32
  }
  func.func @transform_23(%arg0: i32) -> (i32, i32) {
    %c0_i32 = arith.constant 0 : i32
    %c0_i32_0 = arith.constant 0 : i32
    %c0_i32_1 = arith.constant 0 : i32
    return %c0_i32, %c0_i32_0 : i32, i32
  }
  func.func @transform_24(%arg0: i32) -> (i32, i32) {
    %c0_i32 = arith.constant 0 : i32
    %c0_i32_0 = arith.constant 0 : i32
    %c0_i32_1 = arith.constant 0 : i32
    return %c0_i32, %c0_i32_0 : i32, i32
  }
}

</mosaic_0001>

<bundles_post_ra>
// kernel: forward.1
= control target key start
LH: loop header
LB: loop body
LE: loop exit
PB: predicated region body
PF: predicated region fallthrough
CT: control target
= control target key end

     0   :  { %s4906_s0 = inlined_call_operand.vmem [shape: s32[16,1], index: 0, kind: input, shape index: {}]   ;;  %s4907_s1 = inlined_call_operand.vmem [shape: s32[16,1], index: 1, kind: input, shape index: {}]   ;;  %s4908_s2 = inlined_call_operand.vmem [shape: s32[1,16], index: 2, kind: input, shape index: {}]   ;;  %s4909_s3 = inlined_call_operand.vmem [shape: bf16[128,128], index: 3, kind: input, shape index: {}]   ;;  %s4910_s4 = inlined_call_operand.hbm [shape: f32[32,128], index: 4, kind: input, shape index: {}]   ;;  %s4911_s5 = inlined_call_operand.vmem [shape: f32[2,128], index: 5, kind: input, shape index: {}]   ;;  %s4912_s6 = inlined_call_operand.vmem [shape: f32[1,128], index: 6, kind: input, shape index: {}]   ;;  %s4913_s7 = inlined_call_operand.hbm [shape: f32[1,128], index: 7, kind: input, shape index: {}]   ;;  %s4914_s8 = inlined_call_operand.hbm [shape: bf16[2,128,384], index: 8, kind: input, shape index: {}]   ;;  %s4915_s9 = inlined_call_operand.vmem [shape: f32[2,1,384], index: 9, kind: input, shape index: {}]   ;;  %s4916_s10 = inlined_call_operand.hbm [shape: bf16[2,32,128], index: 10, kind: input, shape index: {}]   ;;  %s4917_s11 = inlined_call_operand.hbm [shape: f32[2,1,128], index: 11, kind: input, shape index: {}]   ;;  %s4918_s12 = inlined_call_operand.hbm [shape: f32[2,1,128], index: 12, kind: input, shape index: {}]   ;;  %s4919_s13 = inlined_call_operand.hbm [shape: f32[2,1,128], index: 13, kind: input, shape index: {}]   ;;  %s4920_s14 = inlined_call_operand.hbm [shape: bf16[2,128,128], index: 14, kind: input, shape index: {}]   ;;  %s4921_s15 = inlined_call_operand.hbm [shape: f32[2,1,128], index: 15, kind: input, shape index: {}]   ;;  %s4922_s16 = inlined_call_operand.hbm [shape: bf16[2,128,128], index: 16, kind: input, shape index: {}]   ;;  %s4923_s17 = inlined_call_operand.hbm [shape: f32[2,1,128], index: 17, kind: input, shape index: {}]   ;;  %s4924_s18 = inlined_call_operand.hbm [shape: f32[2,1,128], index: 18, kind: input, shape index: {}]   ;;  %s4925_s19 = inlined_call_operand.hbm [shape: f32[2,1,128], index: 19, kind: input, shape index: {}]   ;;  %s4926_s20 = inlined_call_operand.hbm [shape: bf16[128,128], index: 20, kind: input, shape index: {}]   ;;  %s4927_s21 = inlined_call_operand.hbm [shape: f32[1,128], index: 21, kind: input, shape index: {}]   ;;  %s4928_s22 = inlined_call_operand.hbm [shape: bf16[128,128], index: 22, kind: input, shape index: {}]   ;;  %s4929_s23 = inlined_call_operand.hbm [shape: f32[1,128], index: 23, kind: input, shape index: {}]   ;;  %s4930_s24 = inlined_call_operand.hbm [shape: f32[2,128], index: 24, kind: output, shape index: {}]  }
   0x1   :  { %4962 = sst [smem:[#allocation40_spill]] %s4906_s0 }
   0x2   :  { %4963 = sst [smem:[#allocation41_spill]] %s4907_s1 }
   0x3   :  { %4964 = sst [smem:[#allocation42_spill]] %s4908_s2 }
   0x4   :  { %4965 = sst [smem:[#allocation43_spill]] %s4909_s3 }
   0x5   :  { %4966 = sst [smem:[#allocation44_spill]] %s4910_s4 }
   0x6   :  { %4967 = sst [smem:[#allocation45_spill]] %s4911_s5 }
   0x7   :  { %4968 = sst [smem:[#allocation46_spill]] %s4912_s6 }
   0x8   :  { %4969 = sst [smem:[#allocation47_spill]] %s4913_s7 }
   0x9   :  { %4970 = sst [smem:[#allocation48_spill]] %s4914_s8 }
   0xa   :  { %4971 = sst [smem:[#allocation49_spill]] %s4915_s9 }
   0xb   :  { %4972 = sst [smem:[#allocation50_spill]] %s4916_s10 }
   0xc   :  { %4973 = sst [smem:[#allocation51_spill]] %s4924_s18 }
   0xd   :  { %4974 = sst [smem:[#allocation52_spill]] %s4925_s19 }
   0xe   :  { %4975 = sst [smem:[#allocation53_spill]] %s4926_s20 }
   0xf   :  { %4976 = sst [smem:[#allocation54_spill]] %s4928_s22 }
  0x10   :  { %4977 = sst [smem:[#allocation55_spill]] %s4929_s23 }
  0x11   :  { %4978 = sst [smem:[#allocation56_spill]] %s4930_s24 }
  0x12   :  { %29 = vsyncpa [#allocation4], 0 }
  0x13   :  { %30 = vsyncpa [#allocation7], 0 }
  0x14   :  { %31 = vsyncpa [#allocation21], 0 }
  0x15   :  { %32 = vsyncpa [#allocation24], 0 }
  0x16   :  { %33 = vsyncpa [#allocation5], 0  ;;  %s4229_s5 = smov 0   ;;  %s4231_s26 = smov 0  }
  0x17   :  { %s4233_s27 = smov 0   ;;  %s4235_s28 = smov 0  }
  0x18 LB: > { %4979 = sst [smem:[#allocation33_spill]] %s4058_s26  ;;  %s4248_s6 = sadd.s32 4294967295, %s4066_s28   ;;  %s4066_s28 = sphi %s4235_s28, %s5042_s28   ;;  %s4062_s27 = sphi %s4233_s27, %s5045_s27   ;;  %s4058_s26 = sphi %s4231_s26, %s5044_s26   ;;  %s4054_s5 = sphi %s4229_s5, %s5043_s5  }
  0x19   : > { %4980 = sst [smem:[#allocation34_spill]] %s4062_s27  ;;  %s4251_s2 = sadd.s32 1, %s4066_s28  }
  0x1a   : > { %4981 = sst [smem:[#allocation35_spill]] %s4248_s6  ;;  %s211_s29 = ssub.s32 %s4066_s28, %s4251_s2 }
  0x1b   : > { %4982 = sst [smem:[#allocation36_spill]] %s4251_s2  ;;  %s214_s0 = sadd.s32 1, %s4062_s27 }
  0x1c   : > { %p212_p0 = scmp.eq.s32.totalorder %s211_s29, 0  ;;  %p221_p1 = scmp.ne.s32.totalorder %s4062_s27, %s4058_s26 }
  0x1d   : > { %p222_p2 = scmp.eq.s32.totalorder %s4066_s28, 0  ;;  %p227_p3 = scmp.ne.s32.totalorder %s4058_s26, %s4054_s5 }
  0x1e   : > { %s4261_s7 = scalar_select %p212_p0, %s4062_s27, %s214_s0  }
  0x1f   : > { %p4263_p4 = por %p222_p2, %p221_p1  ;;  %p4936_p5 = scmp.eq.s32.totalorder %s4248_s6, 0 }
  0x20   : > { %4983 = sst [smem:[#allocation37_spill]] %s4261_s7  ;;  %p2877_p6 = scmp.ge.s32.totalorder %s4066_s28, 1 }
  0x21   : > { %p629_p7 = scmp.lt.s32.totalorder %s4066_s28, 3  ;;  %p4272_p8 = por %p4936_p5, %p227_p3 }
  0x22   : > { %s4068_s8 = smov [#allocation3]   ;;  %p3339_p13 = scmp.lt.s32.totalorder %s4066_s28, 2 }
  0x23   : > { %s4985_s3 = scalar_select %p4272_p8, 1, 0 }
  0x24   : > { %p4277_p10 = pnand %p2877_p6, %p629_p7  ;;  %s653_s4 = sshll.u32 %s4068_s8, 4  ;;  %s654_s4 = int_to_ptr.vmem [resolvable:$true] %s653_s4 }
  0x25   : > { %4986 = sst [smem:[#allocation38_spill]] %s4985_s3  ;;  %s732_s5 = sand.u32 1, %s4066_s28  }
  0x26   : > { %s4987_s25 = scalar_select %p4277_p10, 1, 0 }
  0x27   : > { %p3280_p11 = pneg %p4277_p10  ;;  %s4292_s29 = sand.u32 1, %s4062_s27  }
  0x28   : > { %4988 = sst [smem:[#allocation39_spill]] %s4987_s25  ;;  %p4296_p0 = pnand %p3339_p13, %p4263_p4 }
  0x29   : > { %p4285_p12 = pnand %p3280_p11, %p4936_p5  ;;  %s3531_s7 = scalar_lea.vmem %s654_s4, 512 }
  0x2a   : > { %s4990_s0 = scalar_select %p4296_p0, 1, 0 }
  0x2b   : > { %s4989_s1 = scalar_select %p4285_p12, 1, 0 }
  0x2c   : > { %p4302_p1 = pneg %p4285_p12  ;;  %p3532_p2 = scmp.ne.s32.totalorder %s654_s4, %s3531_s7 }
  0x2d   : > { %p3539_p7 = scmp.lt.s32.totalorder %s654_s4, %s654_s4  ;;  %p3540_p11 = scmp.lt.s32.totalorder %s3531_s7, %s3531_s7 }
  0x2e   : > { %s4991_s8 = scalar_select %p4302_p1, 1, 0 }
  0x2f   : > { %p3534_p3 = pnand %p3532_p2, %p4302_p1  ;;  %p3541_p9 = por %p3540_p11, %p3539_p7 }
  0x31   : > { %p3535_p6 = pneg %p3534_p3 }
  0x33   : > { %p3542_p5 = pnand %p3541_p9, %p3535_p6 }
  0x35   : > { %3545 = shalt.err (!%p3542_p5)
}
  0x36   : > { %s4069_s30 = smov 128   ;;  %s4070_s27 = smov 8  }
  0x37   : > { %s4992_s9 = sld [smem:[#allocation44_spill]]  ;;  %s3226_s3 = smul.u32 192, %s4292_s29 }
  0x38   : > { %s3227_s26 = smul.u32 3072, %s4066_s28  ;;  %s4993_s23 = sld [smem:[#allocation48_spill]] }
  0x39   : > { %s736_s19 = scalar_lea.vmem [#allocation8], %s3226_s3  ;;  %s4322_s20 = scalar_lea.sflag [#allocation4], %s732_s5 }
  0x3a   : > { %s743_s22 = sshll.u32 %s736_s19, 4  ;;  %p4328_p5 = pneg %p4296_p0  ;;  %s4320_s22 = int_to_ptr.vmem [resolvable:$true] %s743_s22 }
  0x3d   : > { %3283 = dma.hbm_to_vmem [thread:$0]  (!%p4285_p12), %s4992_s9, 512, %s654_s4, [#allocation4], %s4069_s30, %s4069_s30, %s4070_s27  }
  0x3e   : > { %s4318_s7 = scalar_lea.hbm %s4993_s23, %s3227_s26  ;;  %s3551_s27 = scalar_lea.hbm %s4993_s23, 6144 }
  0x3f   : > { %s3546_s18 = scalar_lea.hbm %s4318_s7, 3072  ;;  %p3552_p2 = scmp.lt.s32.totalorder %s4318_s7, %s4993_s23 }
  0x40   : > { %p3547_p4 = scmp.ne.s32.totalorder %s4318_s7, %s3546_s18  ;;  %p3553_p3 = scmp.lt.s32.totalorder %s3551_s27, %s3546_s18 }
  0x42   : > { %p3549_p9 = pnand %p4328_p5, %p3547_p4  ;;  %p3554_p6 = por %p3553_p3, %p3552_p2 }
  0x44   : > { %p3550_p13 = pneg %p3549_p9 }
  0x46   : > { %p3555_p7 = pnand %p3554_p6, %p3550_p13 }
  0x48   : > { %3558 = shalt.err (!%p3555_p7)
}
  0x49   : > { %s3559_s2 = scalar_lea.vmem %s4320_s22, 3072  ;;  %s4071_s3 = smov [#allocation8]  }
  0x4a   : > { %p3560_p11 = scmp.ne.s32.totalorder %s4320_s22, %s3559_s2  ;;  %s3564_s25 = sshll.u32 %s4071_s3, 4  ;;  %s3565_s25 = int_to_ptr.vmem [resolvable:$false] %s3564_s25 }
  0x4b   : > { %s3566_s4 = scalar_lea.vmem %s3565_s25, 6144  ;;  %p3567_p8 = scmp.lt.s32.totalorder %s4320_s22, %s3565_s25 }
  0x4c   : > { %p3562_p4 = pnand %p3560_p11, %p4328_p5  ;;  %p3568_p10 = scmp.lt.s32.totalorder %s3566_s4, %s3559_s2 }
  0x4e   : > { %p3563_p9 = pneg %p3562_p4  ;;  %p3569_p12 = por %p3568_p10, %p3567_p8 }
  0x50   : > { %p3570_p1 = pnand %p3569_p12, %p3563_p9 }
  0x52   : > { %3573 = shalt.err (!%p3570_p1)
}
  0x53   : > { %s4072_s18 = smov 192   ;;  %s4073_s5 = smov 12  }
  0x54   : > { %3302 = dma.hbm_to_vmem [thread:$0]  (!%p4296_p0), %s4318_s7, 3072, %s4320_s22, %s4322_s20, %s4072_s18, %s4072_s18, %s4073_s5  }
  0x55   : > { %s2886_s30 = sshll.u32 %s4292_s29, 4  ;;  %s3006_s24 = sshll.u32 %s4066_s28, 8 }
  0x56   : > { %s4995_s10 = sld [smem:[#allocation50_spill]]  ;;  %s764_s6 = scalar_lea.vmem [#allocation9], %s2886_s30 }
  0x57   : > { %s771_s2 = sshll.u32 %s764_s6, 4  ;;  %s4361_s3 = sshll.u32 %s4066_s28, 4  ;;  %s4358_s2 = int_to_ptr.vmem [resolvable:$true] %s771_s2 }
  0x5c   : > { %s4356_s19 = scalar_lea.hbm %s4995_s10, %s3006_s24  ;;  %s3579_s4 = scalar_lea.hbm %s4995_s10, 512 }
  0x5d   : > { %s3574_s25 = scalar_lea.hbm %s4356_s19, 256  ;;  %p3580_p1 = scmp.lt.s32.totalorder %s4356_s19, %s4995_s10 }
  0x5e   : > { %p3575_p8 = scmp.ne.s32.totalorder %s4356_s19, %s3574_s25  ;;  %p3581_p13 = scmp.lt.s32.totalorder %s3579_s4, %s3574_s25 }
  0x60   : > { %p3577_p10 = pnand %p3575_p8, %p4328_p5  ;;  %p3582_p2 = por %p3581_p13, %p3580_p1 }
  0x62   : > { %p3578_p12 = pneg %p3577_p10 }
  0x64   : > { %p3583_p3 = pnand %p3582_p2, %p3578_p12 }
  0x66   : > { %3586 = shalt.err (!%p3583_p3)
}
  0x67   : > { %s3587_s30 = scalar_lea.vmem %s4358_s2, 256  ;;  %s4074_s24 = smov [#allocation9]  }
  0x68   : > { %p3588_p6 = scmp.ne.s32.totalorder %s4358_s2, %s3587_s30  ;;  %s3592_s26 = sshll.u32 %s4074_s24, 4  ;;  %s3593_s26 = int_to_ptr.vmem [resolvable:$false] %s3592_s26 }
  0x69   : > { %s3594_s27 = scalar_lea.vmem %s3593_s26, 512  ;;  %p3595_p4 = scmp.lt.s32.totalorder %s4358_s2, %s3593_s26 }
  0x6a   : > { %p3590_p7 = pnand %p3588_p6, %p4328_p5  ;;  %p3596_p9 = scmp.lt.s32.totalorder %s3594_s27, %s3587_s30 }
  0x6c   : > { %p3591_p11 = pneg %p3590_p7  ;;  %p3597_p8 = por %p3596_p9, %p3595_p4 }
  0x6e   : > { %p3598_p10 = pnand %p3597_p8, %p3591_p11 }
  0x70   : > { %3601 = shalt.err (!%p3598_p10)
}
  0x71   : > { %s4075_s6 = smov 64   ;;  %s4076_s25 = smov 4  }
  0x72   : > { %3305 = dma.hbm_to_vmem [thread:$0]  (!%p4296_p0), %s4356_s19, 256, %s4358_s2, %s4322_s20, %s4075_s6, %s4075_s6, %s4076_s25  }
  0x73   : > { %s789_s4 = scalar_lea.hbm %s4917_s11, %s4361_s3  ;;  %s784_s18 = scalar_lea.vmem [#allocation10], %s4292_s29 }
  0x74   : > { %s791_s5 = sshll.u32 %s784_s18, 4  ;;  %s3602_s30 = scalar_lea.hbm %s789_s4, 16  ;;  %s792_s5 = int_to_ptr.vmem [resolvable:$true] %s791_s5 }
  0x75   : > { %p3603_p12 = scmp.ne.s32.totalorder %s789_s4, %s3602_s30  ;;  %s3607_s27 = scalar_lea.hbm %s4917_s11, 32 }
  0x76   : > { %p3608_p2 = scmp.lt.s32.totalorder %s789_s4, %s4917_s11  ;;  %p3609_p3 = scmp.lt.s32.totalorder %s3607_s27, %s3602_s30 }
  0x77   : > { %p3605_p1 = pnand %p3603_p12, %p4328_p5 }
  0x78   : > { %p3610_p6 = por %p3609_p3, %p3608_p2 }
  0x79   : > { %p3606_p13 = pneg %p3605_p1 }
  0x7b   : > { %p3611_p7 = pnand %p3610_p6, %p3606_p13 }
  0x7d   : > { %3614 = shalt.err (!%p3611_p7)
}
  0x7e   : > { %s3615_s19 = scalar_lea.vmem %s792_s5, 16  ;;  %s4077_s2 = smov [#allocation10]  }
  0x7f   : > { %p3616_p11 = scmp.ne.s32.totalorder %s792_s5, %s3615_s19  ;;  %s3620_s22 = sshll.u32 %s4077_s2, 4  ;;  %s3621_s22 = int_to_ptr.vmem [resolvable:$false] %s3620_s22 }
  0x80   : > { %s3622_s7 = scalar_lea.vmem %s3621_s22, 32  ;;  %p3623_p8 = scmp.lt.s32.totalorder %s792_s5, %s3621_s22 }
  0x81   : > { %p3618_p4 = pnand %p3616_p11, %p4328_p5  ;;  %p3624_p10 = scmp.lt.s32.totalorder %s3622_s7, %s3615_s19 }
  0x83   : > { %p3619_p9 = pneg %p3618_p4  ;;  %p3625_p12 = por %p3624_p10, %p3623_p8 }
  0x85   : > { %p3626_p1 = pnand %p3625_p12, %p3619_p9 }
  0x87   : > { %3629 = shalt.err (!%p3626_p1)
}
  0x88   : > { %3308 = dma.hbm_to_vmem [thread:$0]  (!%p4296_p0), %s789_s4, 16, %s792_s5, %s4322_s20  }
  0x89   : > { %s806_s18 = scalar_lea.hbm %s4918_s12, %s4361_s3  ;;  %s801_s30 = scalar_lea.vmem [#allocation11], %s4292_s29 }
  0x8a   : > { %s808_s24 = sshll.u32 %s801_s30, 4  ;;  %s3630_s26 = scalar_lea.hbm %s806_s18, 16  ;;  %s809_s24 = int_to_ptr.vmem [resolvable:$true] %s808_s24 }
  0x8b   : > { %p3631_p13 = scmp.ne.s32.totalorder %s806_s18, %s3630_s26  ;;  %s3635_s2 = scalar_lea.hbm %s4918_s12, 32 }
  0x8c   : > { %p3636_p6 = scmp.lt.s32.totalorder %s806_s18, %s4918_s12  ;;  %p3637_p7 = scmp.lt.s32.totalorder %s3635_s2, %s3630_s26 }
  0x8d   : > { %p3633_p2 = pnand %p3631_p13, %p4328_p5 }
  0x8e   : > { %p3638_p11 = por %p3637_p7, %p3636_p6 }
  0x8f   : > { %p3634_p3 = pneg %p3633_p2 }
  0x91   : > { %p3639_p4 = pnand %p3638_p11, %p3634_p3 }
  0x93   : > { %3642 = shalt.err (!%p3639_p4)
}
  0x94   : > { %s3643_s4 = scalar_lea.vmem %s809_s24, 16  ;;  %s4078_s5 = smov [#allocation11]  }
  0x95   : > { %p3644_p9 = scmp.ne.s32.totalorder %s809_s24, %s3643_s4  ;;  %s3648_s10 = sshll.u32 %s4078_s5, 4  ;;  %s3649_s10 = int_to_ptr.vmem [resolvable:$false] %s3648_s10 }
  0x96   : > { %s3650_s23 = scalar_lea.vmem %s3649_s10, 32  ;;  %p3651_p12 = scmp.lt.s32.totalorder %s809_s24, %s3649_s10 }
  0x97   : > { %p3646_p8 = pnand %p3644_p9, %p4328_p5  ;;  %p3652_p1 = scmp.lt.s32.totalorder %s3650_s23, %s3643_s4 }
  0x99   : > { %p3647_p10 = pneg %p3646_p8  ;;  %p3653_p13 = por %p3652_p1, %p3651_p12 }
  0x9b   : > { %p3654_p2 = pnand %p3653_p13, %p3647_p10 }
  0x9d   : > { %3657 = shalt.err (!%p3654_p2)
}
  0x9e   : > { %3311 = dma.hbm_to_vmem [thread:$0]  (!%p4296_p0), %s806_s18, 16, %s809_s24, %s4322_s20  }
  0x9f   : > { %s4427_s27 = scalar_lea.hbm %s4919_s13, %s4361_s3  ;;  %s818_s19 = scalar_lea.vmem [#allocation12], %s4292_s29 }
  0xa0   : > { %s825_s2 = sshll.u32 %s818_s19, 4  ;;  %s4956_s22 = sshll.u32 %s4292_s29, 6  ;;  %s826_s2 = int_to_ptr.vmem [resolvable:$true] %s825_s2 }
  0xa1   : > { %s3658_s7 = scalar_lea.hbm %s4427_s27, 16  ;;  %s3663_s18 = scalar_lea.hbm %s4919_s13, 32 }
  0xa2   : > { %p3659_p3 = scmp.ne.s32.totalorder %s4427_s27, %s3658_s7  ;;  %p3664_p11 = scmp.lt.s32.totalorder %s4427_s27, %s4919_s13 }
  0xa3   : > { %p3665_p4 = scmp.lt.s32.totalorder %s3663_s18, %s3658_s7 }
  0xa4   : > { %p3661_p6 = pnand %p3659_p3, %p4328_p5 }
  0xa5   : > { %p3666_p9 = por %p3665_p4, %p3664_p11 }
  0xa6   : > { %p3662_p7 = pneg %p3661_p6 }
  0xa8   : > { %p3667_p8 = pnand %p3666_p9, %p3662_p7 }
  0xaa   : > { %3670 = shalt.err (!%p3667_p8)
}
  0xab   : > { %s3671_s23 = scalar_lea.vmem %s826_s2, 16  ;;  %s4079_s30 = smov [#allocation12]  }
  0xac   : > { %p3672_p10 = scmp.ne.s32.totalorder %s826_s2, %s3671_s23  ;;  %s3676_s26 = sshll.u32 %s4079_s30, 4  ;;  %s3677_s26 = int_to_ptr.vmem [resolvable:$false] %s3676_s26 }
  0xad   : > { %s3678_s19 = scalar_lea.vmem %s3677_s26, 32  ;;  %p3679_p13 = scmp.lt.s32.totalorder %s826_s2, %s3677_s26 }
  0xae   : > { %p3674_p12 = pnand %p3672_p10, %p4328_p5  ;;  %p3680_p2 = scmp.lt.s32.totalorder %s3678_s19, %s3671_s23 }
  0xb0   : > { %p3675_p1 = pneg %p3674_p12  ;;  %p3681_p3 = por %p3680_p2, %p3679_p13 }
  0xb2   : > { %p3682_p6 = pnand %p3681_p3, %p3675_p1 }
  0xb4   : > { %3685 = shalt.err (!%p3682_p6)
}
  0xb5   : > { %3314 = dma.hbm_to_vmem [thread:$0]  (!%p4296_p0), %s4427_s27, 16, %s826_s2, %s4322_s20  }
  0xb6   : > { %s4957_s7 = sshll.u32 %s4066_s28, 10  ;;  %s836_s24 = scalar_lea.vmem [#allocation13], %s4956_s22 }
  0xb7   : > { %s4454_s18 = scalar_lea.hbm %s4920_s14, %s4957_s7  ;;  %s843_s10 = sshll.u32 %s836_s24, 4  ;;  %s844_s10 = int_to_ptr.vmem [resolvable:$true] %s843_s10 }
  0xb8   : > { %s3686_s23 = scalar_lea.hbm %s4454_s18, 1024  ;;  %s3691_s30 = scalar_lea.hbm %s4920_s14, 2048 }
  0xb9   : > { %p3687_p7 = scmp.ne.s32.totalorder %s4454_s18, %s3686_s23  ;;  %p3692_p9 = scmp.lt.s32.totalorder %s4454_s18, %s4920_s14 }
  0xba   : > { %p3693_p8 = scmp.lt.s32.totalorder %s3691_s30, %s3686_s23 }
  0xbb   : > { %p3689_p11 = pnand %p3687_p7, %p4328_p5 }
  0xbc   : > { %p3694_p10 = por %p3693_p8, %p3692_p9 }
  0xbd   : > { %p3690_p4 = pneg %p3689_p11 }
  0xbf   : > { %p3695_p12 = pnand %p3694_p10, %p3690_p4 }
  0xc1   : > { %3698 = shalt.err (!%p3695_p12)
}
  0xc2   : > { %s3699_s4 = scalar_lea.vmem %s844_s10, 1024  ;;  %s4080_s5 = smov [#allocation13]  }
  0xc3   : > { %p3700_p1 = scmp.ne.s32.totalorder %s844_s10, %s3699_s4  ;;  %s3704_s24 = sshll.u32 %s4080_s5, 4  ;;  %s3705_s24 = int_to_ptr.vmem [resolvable:$false] %s3704_s24 }
  0xc4   : > { %s3706_s22 = scalar_lea.vmem %s3705_s24, 2048  ;;  %p3707_p3 = scmp.lt.s32.totalorder %s844_s10, %s3705_s24 }
  0xc5   : > { %p3702_p13 = pnand %p3700_p1, %p4328_p5  ;;  %p3708_p6 = scmp.lt.s32.totalorder %s3706_s22, %s3699_s4 }
  0xc7   : > { %p3703_p2 = pneg %p3702_p13  ;;  %p3709_p7 = por %p3708_p6, %p3707_p3 }
  0xc9   : > { %p3710_p11 = pnand %p3709_p7, %p3703_p2 }
  0xcb   : > { %3713 = shalt.err (!%p3710_p11)
}
  0xcc   : > { %3317 = dma.hbm_to_vmem [thread:$0]  (!%p4296_p0), %s4454_s18, 1024, %s844_s10, %s4322_s20, %s4075_s6, %s4075_s6, %s4076_s25  }
  0xcd   : > { %s861_s2 = scalar_lea.hbm %s4921_s15, %s4361_s3  ;;  %s856_s30 = scalar_lea.vmem [#allocation14], %s4292_s29 }
  0xce   : > { %s863_s22 = sshll.u32 %s856_s30, 4  ;;  %s3714_s26 = scalar_lea.hbm %s861_s2, 16  ;;  %s864_s22 = int_to_ptr.vmem [resolvable:$true] %s863_s22 }
  0xcf   : > { %p3715_p4 = scmp.ne.s32.totalorder %s861_s2, %s3714_s26  ;;  %s3719_s5 = scalar_lea.hbm %s4921_s15, 32 }
  0xd0   : > { %p3720_p10 = scmp.lt.s32.totalorder %s861_s2, %s4921_s15  ;;  %p3721_p12 = scmp.lt.s32.totalorder %s3719_s5, %s3714_s26 }
  0xd1   : > { %p3717_p9 = pnand %p3715_p4, %p4328_p5 }
  0xd2   : > { %p3722_p1 = por %p3721_p12, %p3720_p10 }
  0xd3   : > { %p3718_p8 = pneg %p3717_p9 }
  0xd5   : > { %p3723_p13 = pnand %p3722_p1, %p3718_p8 }
  0xd7   : > { %3726 = shalt.err (!%p3723_p13)
}
  0xd8   : > { %s3727_s18 = scalar_lea.vmem %s864_s22, 16  ;;  %s4081_s10 = smov [#allocation14]  }
  0xd9   : > { %p3728_p2 = scmp.ne.s32.totalorder %s864_s22, %s3727_s18  ;;  %s3732_s23 = sshll.u32 %s4081_s10, 4  ;;  %s3733_s23 = int_to_ptr.vmem [resolvable:$false] %s3732_s23 }
  0xda   : > { %s3734_s27 = scalar_lea.vmem %s3733_s23, 32  ;;  %p3735_p7 = scmp.lt.s32.totalorder %s864_s22, %s3733_s23 }
  0xdb   : > { %p3730_p3 = pnand %p3728_p2, %p4328_p5  ;;  %p3736_p11 = scmp.lt.s32.totalorder %s3734_s27, %s3727_s18 }
  0xdd   : > { %p3731_p6 = pneg %p3730_p3  ;;  %p3737_p4 = por %p3736_p11, %p3735_p7 }
  0xdf   : > { %p3738_p9 = pnand %p3737_p4, %p3731_p6 }
  0xe1   : > { %3741 = shalt.err (!%p3738_p9)
}
  0xe2   : > { %3320 = dma.hbm_to_vmem [thread:$0]  (!%p4296_p0), %s861_s2, 16, %s864_s22, %s4322_s20  }
  0xe3   : > { %s4996_s7 = sshll.u32 %s4066_s28, 10  ;;  %s4997_s4 = sshll.u32 %s4292_s29, 6 }
  0xe4   : > { %s4501_s19 = scalar_lea.hbm %s4922_s16, %s4996_s7  ;;  %s874_s5 = scalar_lea.vmem [#allocation15], %s4997_s4 }
  0xe5   : > { %s881_s24 = sshll.u32 %s874_s5, 4  ;;  %s3742_s18 = scalar_lea.hbm %s4501_s19, 1024  ;;  %s882_s24 = int_to_ptr.vmem [resolvable:$true] %s881_s24 }
  0xe6   : > { %p3743_p8 = scmp.ne.s32.totalorder %s4501_s19, %s3742_s18  ;;  %s3747_s28 = scalar_lea.hbm %s4922_s16, 2048 }
  0xe7   : > { %p3748_p1 = scmp.lt.s32.totalorder %s4501_s19, %s4922_s16  ;;  %p3749_p13 = scmp.lt.s32.totalorder %s3747_s28, %s3742_s18 }
  0xe8   : > { %p3745_p10 = pnand %p3743_p8, %p4328_p5 }
  0xe9   : > { %p3750_p2 = por %p3749_p13, %p3748_p1 }
  0xea   : > { %p3746_p12 = pneg %p3745_p10 }
  0xec   : > { %p3751_p3 = pnand %p3750_p2, %p3746_p12 }
  0xee   : > { %3754 = shalt.err (!%p3751_p3)
}
  0xef   : > { %s3755_s27 = scalar_lea.vmem %s882_s24, 1024  ;;  %s4082_s7 = smov [#allocation15]  }
  0xf0   : > { %p3756_p6 = scmp.ne.s32.totalorder %s882_s24, %s3755_s27  ;;  %s3760_s30 = sshll.u32 %s4082_s7, 4  ;;  %s3761_s30 = int_to_ptr.vmem [resolvable:$false] %s3760_s30 }
  0xf1   : > { %s3762_s26 = scalar_lea.vmem %s3761_s30, 2048  ;;  %p3763_p4 = scmp.lt.s32.totalorder %s882_s24, %s3761_s30 }
  0xf2   : > { %p3758_p7 = pnand %p3756_p6, %p4328_p5  ;;  %p3764_p9 = scmp.lt.s32.totalorder %s3762_s26, %s3755_s27 }
  0xf4   : > { %p3759_p11 = pneg %p3758_p7  ;;  %p3765_p8 = por %p3764_p9, %p3763_p4 }
  0xf6   : > { %p3766_p10 = pnand %p3765_p8, %p3759_p11 }
  0xf8   : > { %3769 = shalt.err (!%p3766_p10)
}
  0xf9   : > { %3323 = dma.hbm_to_vmem [thread:$0]  (!%p4296_p0), %s4501_s19, 1024, %s882_s24, %s4322_s20, %s4075_s6, %s4075_s6, %s4076_s25  }
  0xfa   : > { %s899_s18 = scalar_lea.hbm %s4923_s17, %s4361_s3  ;;  %s894_s10 = scalar_lea.vmem [#allocation16], %s4292_s29 }
  0xfb   : > { %s901_s2 = sshll.u32 %s894_s10, 4  ;;  %s3770_s28 = scalar_lea.hbm %s899_s18, 16  ;;  %s902_s2 = int_to_ptr.vmem [resolvable:$true] %s901_s2 }
  0xfc   : > { %p3771_p12 = scmp.ne.s32.totalorder %s899_s18, %s3770_s28  ;;  %s3775_s27 = scalar_lea.hbm %s4923_s17, 32 }
  0xfd   : > { %p3776_p2 = scmp.lt.s32.totalorder %s899_s18, %s4923_s17  ;;  %p3777_p3 = scmp.lt.s32.totalorder %s3775_s27, %s3770_s28 }
  0xfe   : > { %p3773_p1 = pnand %p3771_p12, %p4328_p5 }
  0xff   : > { %p3778_p6 = por %p3777_p3, %p3776_p2 }
 0x100   : > { %p3774_p13 = pneg %p3773_p1 }
 0x102   : > { %p3779_p7 = pnand %p3778_p6, %p3774_p13 }
 0x104   : > { %3782 = shalt.err (!%p3779_p7)
}
 0x105   : > { %s3783_s19 = scalar_lea.vmem %s902_s2, 16  ;;  %s4083_s24 = smov [#allocation16]  }
 0x106   : > { %p3784_p11 = scmp.ne.s32.totalorder %s902_s2, %s3783_s19  ;;  %s3788_s26 = sshll.u32 %s4083_s24, 4  ;;  %s3789_s26 = int_to_ptr.vmem [resolvable:$false] %s3788_s26 }
 0x107   : > { %s3790_s4 = scalar_lea.vmem %s3789_s26, 32  ;;  %p3791_p8 = scmp.lt.s32.totalorder %s902_s2, %s3789_s26 }
 0x108   : > { %p3786_p4 = pnand %p3784_p11, %p4328_p5  ;;  %p3792_p10 = scmp.lt.s32.totalorder %s3790_s4, %s3783_s19 }
 0x10a   : > { %p3787_p9 = pneg %p3786_p4  ;;  %p3793_p12 = por %p3792_p10, %p3791_p8 }
 0x10c   : > { %p3794_p1 = pnand %p3793_p12, %p3787_p9 }
 0x10e   : > { %3797 = shalt.err (!%p3794_p1)
}
 0x10f   : > { %3326 = dma.hbm_to_vmem [thread:$0]  (!%p4296_p0), %s899_s18, 16, %s902_s2, %s4322_s20  }
 0x110   : > { %s4084_s5 = smov [#allocation6]   ;;  %s4085_s28 = smov [#allocation20]  }
 0x111   : > { %s673_s10 = sshll.u32 %s4084_s5, 4  ;;  %s697_s22 = sshll.u32 %s4085_s28, 4  ;;  %s674_s10 = int_to_ptr.vmem [resolvable:$true] %s673_s10  ;;  %s698_s22 = int_to_ptr.vmem [resolvable:$true] %s697_s22 }
 0x112   : > { %s3809_s23 = scalar_lea.vmem %s674_s10, 16  ;;  %p4998_p2 = scmp.ne.s32.totalorder %s4991_s8, 0 }
 0x113   : > { %p3810_p13 = scmp.ne.s32.totalorder %s674_s10, %s3809_s23  ;;  %s3816_s27 = scalar_lea.vmem %s674_s10, 32 }
 0x114   : > { %p3817_p7 = scmp.lt.s32.totalorder %s674_s10, %s674_s10  ;;  %p3818_p11 = scmp.lt.s32.totalorder %s3816_s27, %s3809_s23 }
 0x115   : > { %p3812_p3 = pnand %p3810_p13, %p4998_p2 }
 0x116   : > { %p3819_p4 = por %p3818_p11, %p3817_p7 }
 0x117   : > { %p3813_p6 = pneg %p3812_p3 }
 0x119   : > { %p3820_p9 = pnand %p3819_p4, %p3813_p6 }
 0x11b   : > { %3823 = shalt.err (!%p3820_p9)
}
 0x11c   : > { %p4999_p8 = scmp.ne.s32.totalorder %s4989_s1, 0  ;;  %s5000_s2 = sld [smem:[#allocation47_spill]] }
 0x11d   : > { %s3835_s30 = scalar_lea.vmem %s698_s22, 16  ;;  %s3842_s19 = scalar_lea.vmem %s698_s22, 32 }
 0x11e   : > { %p3836_p10 = scmp.ne.s32.totalorder %s698_s22, %s3835_s30  ;;  %p3843_p13 = scmp.lt.s32.totalorder %s698_s22, %s698_s22 }
 0x11f   : > { %p3844_p3 = scmp.lt.s32.totalorder %s3842_s19, %s3835_s30 }
 0x120   : > { %p3838_p12 = pnand %p3836_p10, %p4998_p2 }
 0x121   : > { %p3845_p0 = por %p3844_p3, %p3843_p13 }
 0x122   : > { %3286 = dma.hbm_to_vmem [thread:$0]  (!%p4999_p8), %s5000_s2, 16, %s674_s10, [#allocation7]  }
 0x123   : > { %p3839_p1 = pneg %p3838_p12 }
 0x125   : > { %p3846_p7 = pnand %p3845_p0, %p3839_p1 }
 0x127   : > { %3849 = shalt.err (!%p3846_p7)
}
 0x128   : > { %3292 = dma.hbm_to_vmem [thread:$0]  (!%p4999_p8), %s4927_s21, 16, %s698_s22, [#allocation21]  }
 0x129   : > { %s5001_s10 = sld [smem:[#allocation51_spill]]  ;;  %s911_s23 = scalar_lea.vmem [#allocation17], %s4292_s29 }
 0x12a   : > { %s918_s27 = sshll.u32 %s911_s23, 4  ;;  %s919_s27 = int_to_ptr.vmem [resolvable:$true] %s918_s27 }
 0x12f   : > { %s916_s28 = scalar_lea.hbm %s5001_s10, %s4361_s3  ;;  %s3855_s30 = scalar_lea.hbm %s5001_s10, 32 }
 0x130   : > { %s3850_s7 = scalar_lea.hbm %s916_s28, 16  ;;  %p3856_p4 = scmp.lt.s32.totalorder %s916_s28, %s5001_s10 }
 0x131   : > { %p3851_p6 = scmp.ne.s32.totalorder %s916_s28, %s3850_s7  ;;  %p3857_p9 = scmp.lt.s32.totalorder %s3855_s30, %s3850_s7 }
 0x133   : > { %p3853_p0 = pnand %p3851_p6, %p4328_p5  ;;  %p3858_p10 = por %p3857_p9, %p3856_p4 }
 0x135   : > { %p3854_p11 = pneg %p3853_p0 }
 0x137   : > { %p3859_p12 = pnand %p3858_p10, %p3854_p11 }
 0x139   : > { %3862 = shalt.err (!%p3859_p12)
}
 0x13a   : > { %s3863_s22 = scalar_lea.vmem %s919_s27, 16  ;;  %s4086_s26 = smov [#allocation17]  }
 0x13b   : > { %p3864_p1 = scmp.ne.s32.totalorder %s919_s27, %s3863_s22  ;;  %s3868_s4 = sshll.u32 %s4086_s26, 4  ;;  %s3869_s4 = int_to_ptr.vmem [resolvable:$false] %s3868_s4 }
 0x13c   : > { %s3870_s5 = scalar_lea.vmem %s3869_s4, 32  ;;  %p3871_p7 = scmp.lt.s32.totalorder %s919_s27, %s3869_s4 }
 0x13d   : > { %p3866_p13 = pnand %p3864_p1, %p4328_p5  ;;  %p3872_p6 = scmp.lt.s32.totalorder %s3870_s5, %s3863_s22 }
 0x13f   : > { %p3867_p3 = pneg %p3866_p13  ;;  %p3873_p0 = por %p3872_p6, %p3871_p7 }
 0x141   : > { %p3874_p8 = pnand %p3873_p0, %p3867_p3 }
 0x143   : > { %3877 = shalt.err (!%p3874_p8)
}
 0x144   : > { %p5002_p2 = scmp.ne.s32.totalorder %s4990_s0, 0  ;;  %s4087_s23 = smov [#allocation19]  }
 0x145   : > { %s683_s7 = sshll.u32 %s4087_s23, 4  ;;  %s4088_s18 = smov [#allocation22]   ;;  %s684_s7 = int_to_ptr.vmem [resolvable:$true] %s683_s7 }
 0x146   : > { %3329 = dma.hbm_to_vmem [thread:$0]  (!%p5002_p2), %s916_s28, 16, %s919_s27, %s4322_s20  }
 0x147   : > { %s707_s2 = sshll.u32 %s4088_s18, 4  ;;  %s3889_s30 = scalar_lea.vmem %s684_s7, 1024  ;;  %s708_s2 = int_to_ptr.vmem [resolvable:$true] %s707_s2 }
 0x148   : > { %p3890_p11 = scmp.ne.s32.totalorder %s684_s7, %s3889_s30  ;;  %p5003_p4 = scmp.ne.s32.totalorder %s4991_s8, 0 }
 0x149   : > { %p3897_p12 = scmp.lt.s32.totalorder %s684_s7, %s684_s7  ;;  %p3898_p1 = scmp.lt.s32.totalorder %s3889_s30, %s3889_s30 }
 0x14a   : > { %p3892_p9 = pnand %p3890_p11, %p5003_p4 }
 0x14b   : > { %p3899_p13 = por %p3898_p1, %p3897_p12 }
 0x14c   : > { %p3893_p10 = pneg %p3892_p9 }
 0x14e   : > { %p3900_p3 = pnand %p3899_p13, %p3893_p10 }
 0x150   : > { %3903 = shalt.err (!%p3900_p3)
}
 0x151   : > { %p5004_p8 = scmp.ne.s32.totalorder %s4989_s1, 0  ;;  %s5005_s19 = sld [smem:[#allocation53_spill]] }
 0x152   : > { %s3915_s24 = scalar_lea.vmem %s708_s2, 1024  ;;  %p3923_p11 = scmp.lt.s32.totalorder %s708_s2, %s708_s2 }
 0x153   : > { %p3916_p7 = scmp.ne.s32.totalorder %s708_s2, %s3915_s24  ;;  %p3924_p9 = scmp.lt.s32.totalorder %s3915_s24, %s3915_s24 }
 0x155   : > { %p3918_p6 = pnand %p3916_p7, %p5003_p4  ;;  %p3925_p10 = por %p3924_p9, %p3923_p11 }
 0x157   : > { %3289 = dma.hbm_to_vmem [thread:$0]  (!%p5004_p8), %s5005_s19, 1024, %s684_s7, [#allocation7], %s4075_s6, %s4075_s6, %s4076_s25  }
 0x158   : > { %p3919_p0 = pneg %p3918_p6 }
 0x15a   : > { %p3926_p12 = pnand %p3925_p10, %p3919_p0 }
 0x15c   : > { %3929 = shalt.err (!%p3926_p12)
}
 0x15d   : > { %s5006_s4 = sld [smem:[#allocation54_spill]]  ;;  %s4089_s5 = smov [#allocation23]  }
 0x15e   : > { %s721_s23 = sshll.u32 %s4089_s5, 4  ;;  %s5007_s30 = sld [smem:[#allocation52_spill]]  ;;  %s722_s23 = int_to_ptr.vmem [resolvable:$true] %s721_s23 }
 0x15f   : > { %s3941_s27 = scalar_lea.vmem %s722_s23, 16  ;;  %s3948_s19 = scalar_lea.vmem %s722_s23, 32 }
 0x160   : > { %p3942_p1 = scmp.ne.s32.totalorder %s722_s23, %s3941_s27  ;;  %p3949_p7 = scmp.lt.s32.totalorder %s722_s23, %s722_s23 }
 0x161   : > { %p3950_p6 = scmp.lt.s32.totalorder %s3948_s19, %s3941_s27 }
 0x162   : > { %p3944_p13 = pnand %p3942_p1, %p5003_p4 }
 0x163   : > { %3295 = dma.hbm_to_vmem [thread:$0]  (!%p5004_p8), %s5006_s4, 1024, %s708_s2, [#allocation21], %s4075_s6, %s4075_s6, %s4076_s25  }
 0x164   : > { %s4599_s28 = scalar_lea.hbm %s5007_s30, %s4361_s3  ;;  %p3945_p3 = pneg %p3944_p13 }
 0x165   : > { %p3951_p0 = por %p3950_p6, %p3949_p7 }
 0x167   : > { %p3952_p11 = pnand %p3951_p0, %p3945_p3 }
 0x169   : > { %3955 = shalt.err (!%p3952_p11)
}
 0x16a   : > { %s5008_s2 = sld [smem:[#allocation55_spill]]  ;;  %s928_s8 = scalar_lea.vmem [#allocation18], %s4292_s29 }
 0x16b   : > { %s935_s3 = sshll.u32 %s928_s8, 4  ;;  %s3956_s24 = scalar_lea.hbm %s4599_s28, 16  ;;  %s936_s3 = int_to_ptr.vmem [resolvable:$true] %s935_s3 }
 0x16c   : > { %p3957_p4 = scmp.ne.s32.totalorder %s4599_s28, %s3956_s24  ;;  %s3961_s1 = scalar_lea.hbm %s5007_s30, 32 }
 0x16d   : > { %p3962_p12 = scmp.lt.s32.totalorder %s4599_s28, %s5007_s30  ;;  %p3963_p1 = scmp.lt.s32.totalorder %s3961_s1, %s3956_s24 }
 0x16e   : > { %p3959_p9 = pnand %p3957_p4, %p4328_p5 }
 0x16f   : > { %p3964_p13 = por %p3963_p1, %p3962_p12 }
 0x170   : > { %3298 = dma.hbm_to_vmem [thread:$0]  (!%p5004_p8), %s5008_s2, 16, %s722_s23, [#allocation24]  }
 0x171   : > { %p3960_p10 = pneg %p3959_p9 }
 0x173   : > { %p3965_p3 = pnand %p3964_p13, %p3960_p10 }
 0x175   : > { %3968 = shalt.err (!%p3965_p3)
}
 0x176   : > { %s3969_s29 = scalar_lea.vmem %s936_s3, 16  ;;  %s4090_s23 = smov [#allocation18]  }
 0x177   : > { %p3970_p8 = scmp.ne.s32.totalorder %s936_s3, %s3969_s29  ;;  %s3974_s7 = sshll.u32 %s4090_s23, 4  ;;  %s3975_s7 = int_to_ptr.vmem [resolvable:$false] %s3974_s7 }
 0x178   : > { %s3976_s18 = scalar_lea.vmem %s3975_s7, 32  ;;  %p3977_p0 = scmp.lt.s32.totalorder %s936_s3, %s3975_s7 }
 0x179   : > { %p3972_p7 = pnand %p3970_p8, %p4328_p5  ;;  %p3978_p11 = scmp.lt.s32.totalorder %s3976_s18, %s3969_s29 }
 0x17b   : > { %p3973_p6 = pneg %p3972_p7  ;;  %p3979_p4 = por %p3978_p11, %p3977_p0 }
 0x17d   : > { %p3980_p9 = pnand %p3979_p4, %p3973_p6 }
 0x17f   : > { %3983 = shalt.err (!%p3980_p9)
}
 0x180   : > { %3332 = dma.hbm_to_vmem [thread:$0]  (!%p5002_p2), %s4599_s28, 16, %s936_s3, %s4322_s20  }
 0x181   : > { %s5009_s27 = sld [smem:[#allocation39_spill]] }
 0x187   : > { %p5010_p10 = scmp.ne.s32.totalorder %s5009_s27, 0 }
 0x188   : > { %s5011_s9 = sld [smem:[#allocation35_spill]] (!%p5010_p10) }
 0x189   : > { %944 = sbr.rel (%p5010_p10) target bundleno = 3565 (0xded), region = 116 }
 0x18e   : > { %p5012_p5 = scmp.eq.s32.totalorder %s5011_s9, 0 }
 0x190   : > { %4025 = dma.done.wait (%p5012_p5), [#allocation4], 512   ;;  %p5013_p12 = pmov %p5012_p5 }
 0x191   : > { %p5014_p1 = pmov %p5012_p5 }
 0x192   : > { %4027 = vsyncadd (%p5013_p12), [#allocation4], 4294966784 }
 0x193   : > { %4029 = dma.done.wait (%p5014_p1), [#allocation7], 16   ;;  %p5015_p13 = pmov %p5014_p1 }
 0x194   : > { %s5016_s0 = sld [smem:[#allocation33_spill]]  ;;  %s954_s6 = sand.u32 1, %s5011_s9  }
 0x195   : > { %4031 = vsyncadd (%p5015_p13), [#allocation7], 4294967280  ;;  %s5017_s19 = sld [smem:[#allocation38_spill]]  ;;  %s955_s25 = scalar_lea.sflag [#allocation4], %s954_s6 }
 0x19a   : > { %s4638_s20 = sand.u32 1, %s5016_s0  }
 0x19b   : > { %s3228_s28 = smul.u32 192, %s4638_s20  ;;  %p5018_p2 = scmp.ne.s32.totalorder %s5017_s19, 0 }
 0x19d   : > { %s4641_s2 = scalar_lea.vmem [#allocation8], %s3228_s28 }
 0x19e   : > { %4033 = dma.done.wait (%p5018_p2), %s955_s25, 5488  }
 0x19f   : > { %4035 = vsyncadd (%p5018_p2), %s955_s25, 4294961808  ;;  %s2905_s8 = sshll.u32 %s4638_s20, 4  ;;  %s2906_s3 = sshll.u32 %s4638_s20, 6 }
 0x1a0   : > { %s4649_s24 = scalar_lea.vmem [#allocation9], %s2905_s8  ;;  %s975_s22 = scalar_lea.vmem [#allocation10], %s4638_s20 }
 0x1a1   : > { %s983_s26 = scalar_lea.vmem [#allocation11], %s4638_s20  ;;  %s4654_s4 = scalar_lea.vmem [#allocation13], %s2906_s3 }
 0x1a2   : > { %s4657_s29 = scalar_lea.vmem [#allocation15], %s2906_s3  ;;  %p5019_p3 = pmov %p5014_p1 }
 0x1a3   : > { %p5020_p8 = pmov %p5014_p1 }
 0x1a4   : > { %4037 = dma.done.wait (%p5019_p3), [#allocation7], 1024  }
 0x1a5   : > { %4039 = vsyncadd (%p5020_p8), [#allocation7], 4294966272  ;;  %p5021_p7 = pmov %p5014_p1 }
 0x1a6   : > { %p5022_p6 = pmov %p5014_p1 }
 0x1a7   : > { %4041 = dma.done.wait (%p5021_p7), [#allocation21], 1040  }
 0x1a8   : > { %4043 = vsyncadd (%p5022_p6), [#allocation21], 4294966256  ;;  %p5023_p0 = pmov %p5014_p1 }
 0x1aa   : > { %4045 = dma.done.wait (%p5023_p0), [#allocation24], 16   ;;  %p5024_p11 = pmov %p5023_p0 }
 0x1ab   : > { %p1164_p4 = scmp.lt.s32.totalorder %s5011_s9, 1  ;;  %s5025_s28 = sld [smem:[#allocation49_spill]] }
 0x1ac   : > { %4047 = vsyncadd (%p5024_p11), [#allocation24], 4294967280  ;;  %p5026_p9 = scmp.ne.s32.totalorder %s5011_s9, 0 }
 0x1ad   : > { %s1165_s27 = scalar_select %p1164_p4, %s5011_s9, 1 }
 0x1ae   : > { %1172 = sbr.rel (%p5026_p9) target bundleno = 937 (0x3a9), region = 188  ;;  %s5027_s18 = sld [smem:[#allocation40_spill]] (!%p5026_p9) }
 0x1af   : > { %s3229_s0 = smul.u32 3, %s1165_s27  ;;  %s5028_s5 = sld [smem:[#allocation43_spill]] (!%p5026_p9) }
 0x1b0   : > { %s5030_s7 = sld [smem:[#allocation41_spill]] (!%p5026_p9) }
 0x1b1   : > { %s4679_s25 = scalar_lea.vmem %s5025_s28, %s3229_s0  ;;  %s5031_s9 = sld [smem:[#allocation45_spill]] (!%p5026_p9) }
 0x1b2   : > { %s5032_s23 = sld [smem:[#allocation46_spill]] (!%p5026_p9) }
 0x1b3   : > { %v4091_v1 = vmov 0   ;;  %v4092_v2 = vmov 0.0   ;;  %vm4093_vm0 = vmmov 0   ;;  %v1177_v16 = vlaneseq  ;;  %v1208_v24 = vld [vmem:[#allocation3] sm:$0xff] }
 0x1b4   : > { %v1173_v0 = vld [vmem:[%s5027_s18] sm:$0xff]  ;;  %3405 = vset.pattern.permute.xlu0 %v4091_v1  ;;  %3074 = vmatprep.subr.bf16.mxu0 %v4092_v2  ;;  %v1174_v4 = vld [vmem:[%s5027_s18 + $0x8] sm:$0xff]  ;;  %v4094_v20 = vmov 1.0|1.0   ;;  %v2928_v56 = vld [vmem:[#allocation6] ss:$0 sm:$0xff] }
 0x1b5   : > { %s5029_s1 = smov %s5028_s5  ;;  %v3407_v3 = vld [vmem:[%s5028_s5 + $0x38] sm:$0xff]   ;;  %1180 = vperm.xlu0 %3405, %v1173_v0   ;;  %3406 = vset.pattern.permute.xlu1 %v4091_v1  ;;  %v1178_v18 = vand.u32 127, %v1177_v16 }
 0x1b6   : > { %3075 = vmatpush3.bf16.msra.mxu0 %v3407_v3  ;;  %v3408_v5 = vld [vmem:[%s5029_s1 + $0x30] sm:$0xff]   ;;  %3090 = vmatprep.mubr.msk.bf16.mxu0 %vm4093_vm0, %v4092_v2  ;;  %v3409_v6 = vld [vmem:[%s5029_s1 + $0x28] sm:$0xff]   ;;  %v1175_v7 = vld [vmem:[%s5030_s7] sm:$0xff] }
 0x1b7   : > { %3076 = vmatprep.subr.bf16.mxu0 %v4092_v2  ;;  %vm1209_vm1 = vcmp.eq.s32.totalorder %v1175_v7, 0  ;;  %v1176_v8 = vld [vmem:[%s5030_s7 + $0x8] sm:$0xff]  ;;  %v3410_v10 = vld [vmem:[%s5029_s1 + $0x20] sm:$0xff]   ;;  %v3411_v12 = vld [vmem:[%s5029_s1 + $0x18] sm:$0xff]  }
 0x1b8   : > { %v1213_v9 = vsel %vm1209_vm1, 1, %v4091_v1  ;;  %vm1210_vm2 = vcmp.eq.s32.totalorder %v1176_v8, 0  ;;  %v3412_v13 = vld [vmem:[%s5029_s1 + $0x10] sm:$0xff]   ;;  %v3413_v14 = vld [vmem:[%s5029_s1 + $0x8] sm:$0xff]   ;;  %v3414_v15 = vld [vmem:[%s5029_s1] sm:$0xff]  }
 0x1b9   : > { %1183 = vperm.xlu0 %3405, %v1174_v4   ;;  %1216 = vperm.xlu1 %3406, %v1213_v9   ;;  %v1214_v11 = vsel %vm1210_vm2, 1, %v4091_v1  ;;  %v2915_v22 = vld [vmem:[%s5031_s9] ss:$0 sm:$0xff]  ;;  %v2916_v23 = vld [vmem:[%s5031_s9 + $0x1] ss:$0 sm:$0xff] }
 0x1ba   : > { %3077 = vmatpush3.bf16.msra.mxu0 %v3408_v5  ;;  %v2927_v54 = vld [vmem:[%s5032_s23] ss:$0 sm:$0xff] }
 0x1bb   : > { %3078 = vmatprep.subr.bf16.mxu0 %v4092_v2 }
 0x1bd   : > { %1219 = vperm.xlu1 %3406, %v1214_v11  }
 0x1be   : > { %3079 = vmatpush3.bf16.msra.mxu0 %v3409_v6 }
 0x1bf   : > { %3080 = vmatprep.subr.bf16.mxu0 %v4092_v2 }
 0x1c2   : > { %3081 = vmatpush3.bf16.msra.mxu0 %v3410_v10 }
 0x1c3   : > { %3082 = vmatprep.subr.bf16.mxu0 %v4092_v2 }
 0x1c6   : > { %3083 = vmatpush3.bf16.msra.mxu0 %v3411_v12 }
 0x1c7   : > { %3084 = vmatprep.subr.bf16.mxu0 %v4092_v2 }
 0x1ca   : > { %3085 = vmatpush3.bf16.msra.mxu0 %v3412_v13 }
 0x1cb   : > { %3086 = vmatprep.subr.bf16.mxu0 %v4092_v2 }
 0x1ce   : > { %3087 = vmatpush3.bf16.msra.mxu0 %v3413_v14 }
 0x1cf   : > { %3088 = vmatprep.subr.bf16.mxu0 %v4092_v2 }
 0x1d2   : > { %3089 = vmatpush3.bf16.msra.mxu0 %v3414_v15 }
 0x230   : > { %v1181_v17 = vpop.permute.xlu0 %1180 }
 0x231   : > { %vm1185_vm3 = vcmp.eq.s32.totalorder %v1178_v18, %v1181_v17 }
 0x234   : > { %v1184_v19 = vpop.permute.xlu0 %1183  ;;  %v1217_v21 = vpop.permute.xlu1 %1216 }
 0x235   : > { %vm1186_vm4 = vcmp.eq.s32.totalorder %v1178_v18, %v1184_v19  ;;  %vm1221_vm6 = vcmp.eq.s32.totalorder %v1217_v21, 1 }
 0x236   : > { %vm2925_vm5 = vmpackc.low %vm1186_vm4, %vm1185_vm3  ;;  %v1231_v25 = vsel %vm1221_vm6, %v2915_v22, %v2916_v23 }
 0x237   : > { %3091 = vmatmul.mubr.msk.bf16.vlgmr.msra.gmra.mxu0 %vm2925_vm5, %v4094_v20 }
 0x238   : > { %v1220_v26 = vpop.permute.xlu1 %1219 }
 0x239   : > { %vm1222_vm7 = vcmp.eq.s32.totalorder %v1220_v26, 1 }
 0x23a   : > { %v1232_v33 = vsel %vm1222_vm7, %v2915_v22, %v2916_v23 }
 0x2f7   : > { %v1315_v27 = vpop.f32.mrf.mxu0 }
 0x2f8   : > { %v1316_v28 = vadd.f32 %v1315_v27, %v1208_v24 }
 0x2f9   : > { %v3092_v29 = vpop.f32.mrf.mxu0 }
 0x2fa   : > { %v1322_v30 = vadd.f32 %v1316_v28, %v1231_v25 }
 0x2fb   : > { %v1318_v31 = vpop.f32.mrf.mxu0 }
 0x2fc   : > { %v1319_v32 = vadd.f32 %v1318_v31, %v1208_v24  ;;  %1326 = vadd.xlane.f32.xlu0 %v1322_v30  ;;  %v1332_v36 = vmul.f32 %v1322_v30, %v1322_v30 }
 0x2fd   : > { %v3093_v34 = vpop.f32.mrf.mxu0 }
 0x2fe   : > { %v1323_v35 = vadd.f32 %v1319_v32, %v1232_v33 }
 0x300   : > { %1334 = vadd.xlane.f32.xlu0 %v1332_v36  ;;  %1328 = vadd.xlane.f32.xlu1 %v1323_v35  ;;  %v1333_v37 = vmul.f32 %v1323_v35, %v1323_v35 }
 0x304   : > { %1336 = vadd.xlane.f32.xlu0 %v1333_v37 }
 0x385   : > { %v1327_v38 = vpop.xlane.xlu0 %1326 }
 0x386   : > { %v1330_v39 = vmul.f32 0.03125, %v1327_v38 }
 0x388   : > { %v1340_v42 = vmul.f32 %v1330_v39, %v1330_v39  ;;  %v1344_v52 = vsub.f32 %v1322_v30, %v1330_v39 }
 0x389   : > { %v1335_v40 = vpop.xlane.xlu0 %1334  ;;  %v1329_v41 = vpop.xlane.xlu1 %1328 }
 0x38a   : > { %v1338_v43 = vmul.f32 0.03125, %v1335_v40  ;;  %v1331_v44 = vmul.f32 0.03125, %v1329_v41 }
 0x38c   : > { %v1342_v45 = vsub.f32 %v1338_v43, %v1340_v42  ;;  %v1341_v48 = vmul.f32 %v1331_v44, %v1331_v44  ;;  %v1345_v58 = vsub.f32 %v1323_v35, %v1331_v44 }
 0x38d   : > { %v1337_v46 = vpop.xlane.xlu0 %1336 }
 0x38e   : > { %v1346_v47 = vadd.f32 1e-12, %v1342_v45  ;;  %v1339_v49 = vmul.f32 0.03125, %v1337_v46 }
 0x390   : > { %3415 = vrsqrt.f32 %v1346_v47  ;;  %v1343_v50 = vsub.f32 %v1339_v49, %v1341_v48 }
 0x392   : > { %v1347_v51 = vadd.f32 1e-12, %v1343_v50 }
 0x394   : > { %3417 = vrsqrt.f32 %v1347_v51 }
 0x39d   : > { %v3416_v53 = vpop.eup %3415 }
 0x39e   : > { %v1350_v55 = vmul.f32 %v3416_v53, %v1344_v52 }
 0x3a0   : > { %v1358_v57 = vmul.f32 %v2927_v54, %v1350_v55 }
 0x3a1   : > { %v3418_v59 = vpop.eup %3417 }
 0x3a2   : > { %v1366_v60 = vadd.f32 %v2928_v56, %v1358_v57  ;;  %v1351_v61 = vmul.f32 %v3418_v59, %v1345_v58 }
 0x3a4   : > { %1368 = vst [vmem:[#allocation2] sm:$0xff] %v1366_v60  ;;  %v1359_v62 = vmul.f32 %v2927_v54, %v1351_v61 }
 0x3a6   : > { %v1367_v63 = vadd.f32 %v2928_v56, %v1359_v62 }
 0x3a8   : > { %1369 = vst [vmem:[#allocation2 + $0x8] sm:$0xff] %v1367_v63 }
 0x3a9 PF: > { %v3424_v0 = vld [vmem:[%s4641_s2 + $0xac] ss:$12 sps:$4 sm:$0xff]   ;;  %v3426_v1 = vld [vmem:[%s4641_s2 + $0xa8] ss:$12 sps:$4 sm:$0xff]   ;;  %v4095_v2 = vmov 0   ;;  %v1374_v5 = vlaneseq  ;;  %s5033_s27 = sld [smem:[#allocation42_spill]] }
 0x3aa   : > { %1625 = vmatprep.mubr.bf16.mxu0 %v4095_v2  ;;  %1593 = vmatprep.subr.bf16.mxu0 %v3424_v0  ;;  %v3427_v3 = vld [vmem:[%s4641_s2 + $0x94] ss:$12 sps:$4 sm:$0xff]   ;;  %v3429_v4 = vld [vmem:[%s4641_s2 + $0x90] ss:$12 sps:$4 sm:$0xff]   ;;  %v3432_v7 = vld [vmem:[%s4641_s2 + $0x78] ss:$12 sps:$4 sm:$0xff]  }
 0x3ab   : > { %1594 = vmatpush1.bf16.msra.mxu0 %v3426_v1  ;;  %v3430_v6 = vld [vmem:[%s4641_s2 + $0x7c] ss:$12 sps:$4 sm:$0xff]   ;;  %v4735_v8 = vshrl.u32 %v1374_v5, 7  ;;  %v3433_v9 = vld [vmem:[%s4641_s2 + $0x64] ss:$12 sps:$4 sm:$0xff]   ;;  %v4096_v26 = vmov 0.0  }
 0x3ac   : > { %1595 = vmatprep.subr.bf16.mxu0 %v3427_v3  ;;  %v3435_v11 = vld [vmem:[%s4641_s2 + $0x60] ss:$12 sps:$4 sm:$0xff]   ;;  %v3438_v15 = vld [vmem:[%s4641_s2 + $0x48] ss:$12 sps:$4 sm:$0xff]   ;;  %v3441_v18 = vld [vmem:[%s4641_s2 + $0x30] ss:$12 sps:$4 sm:$0xff]   ;;  %3094 = vmatprep.subr.bf16.mxu1 %v4096_v26 }
 0x3ad   : > { %v3436_v12 = vld [vmem:[%s4641_s2 + $0x4c] ss:$12 sps:$4 sm:$0xff]   ;;  %v1406_v13 = vsub.s32 0, %v4735_v8  ;;  %v3439_v17 = vld [vmem:[%s4641_s2 + $0x34] ss:$12 sps:$4 sm:$0xff]   ;;  %vm4097_vm9 = vmmov 0  }
 0x3ae   : > { %v3442_v19 = vld [vmem:[%s4641_s2 + $0x1c] ss:$12 sps:$4 sm:$0xff]   ;;  %v3444_v20 = vld [vmem:[%s4641_s2 + $0x18] ss:$12 sps:$4 sm:$0xff]   ;;  %v3447_v22 = vld [vmem:[%s4641_s2] ss:$12 sps:$4 sm:$0xff]   ;;  %3110 = vmatprep.mubr.msk.bf16.mxu1 %vm4097_vm9, %v4096_v26 }
 0x3af   : > { %1596 = vmatpush1.bf16.msra.mxu0 %v3429_v4  ;;  %v1370_v10 = vld [vmem:[%s5033_s27] sm:$0x1]  ;;  %v3445_v21 = vld [vmem:[%s4641_s2 + $0x4] ss:$12 sps:$4 sm:$0xff]   ;;  %v4755_v24 = vld [vmem:[#allocation2 + $0x8] sm:$0xff]  ;;  %v1456_v27 = vsub.s32 1, %v4735_v8 }
 0x3b0   : > { %1597 = vmatprep.subr.bf16.mxu0 %v3430_v6  ;;  %vm1402_vm8 = vcmp.gt.s32.totalorder %v1370_v10, 0  ;;  %v4753_v23 = vld [vmem:[#allocation2] sm:$0xff]  ;;  %vm1680_vm10 = vcmask 130048   ;;  %s4098_s19 = smov 112   ;;  %v3449_v43 = vld [vmem:[%s4641_s2 + $0x98] ss:$12 sps:$4 sm:$0xff]  }
 0x3b1   : > { %v1403_v14 = vsel %vm1402_vm8, 1, %v4095_v2  ;;  %v1415_v25 = vpack.c.bf16 %v4755_v24, %v4753_v23  ;;  %v4767_v29 = vld [vmem:[%s4679_s25] sm:$0x7]  ;;  %v3451_v45 = vld [vmem:[%s4641_s2 + $0x68] ss:$12 sps:$4 sm:$0xff]   ;;  %v1375_v53 = vand.u32 127, %v1374_v5 }
 0x3b2   : > { %v4745_v16 = vrot.slane %v1403_v14, %v1406_v13  ;;  %v1457_v31 = vrot.slane %v4767_v29, %v1456_v27  ;;  %v1453_v34 = vrot.slane %v4767_v29, %v1406_v13  ;;  %v3448_v42 = vld [vmem:[%s4641_s2 + $0xb0] ss:$12 sps:$4 sm:$0xff]   ;;  %v3450_v44 = vld [vmem:[%s4641_s2 + $0x80] ss:$12 sps:$4 sm:$0xff]   ;;  %v3453_v47 = vld [vmem:[%s4641_s2 + $0x38] ss:$12 sps:$4 sm:$0xff]  }
 0x3b3   : > { %1598 = vmatpush1.bf16.msra.mxu0 %v3432_v7  ;;  %3095 = vmatpush3.bf16.msra.mxu1 %v3448_v42  ;;  %v3452_v46 = vld [vmem:[%s4641_s2 + $0x50] ss:$12 sps:$4 sm:$0xff]   ;;  %v3454_v48 = vld [vmem:[%s4641_s2 + $0x20] ss:$12 sps:$4 sm:$0xff]   ;;  %v3455_v49 = vld [vmem:[%s4641_s2 + $0x8] ss:$12 sps:$4 sm:$0xff]  }
 0x3b4   : > { %1599 = vmatprep.subr.bf16.mxu0 %v3433_v9  ;;  %3096 = vmatprep.subr.bf16.mxu1 %v4096_v26  ;;  %vm1408_vm11 = vcmp.eq.s32.totalorder %v4745_v16, 1  ;;  %vm1385_vm12 = vcmp.lt.s32.totalorder %v1375_v53, 8  ;;  %vm1394_vm13 = vcmp.ge.s32.totalorder %v1375_v53, 8  ;;  %vm1397_vm14 = vcmp.lt.s32.totalorder %v1375_v53, 16  ;;  %s4100_s2 = smov 16   ;;  %s5039_s25 = sld [smem:[#allocation35_spill]] }
 0x3b5   : > { %vm1409_vm15 = vmand %vm1385_vm12, %vm1408_vm11  ;;  %v4099_v54 = vmov -1e+09   ;;  %vm1953_vm2 = vcmask 261120  }
 0x3b6   : > { %vm1399_vm0 = vmand %vm1394_vm13, %vm1397_vm14  ;;  %v1411_v55 = vsel %vm1409_vm15, 0.0, %v4099_v54 }
 0x3b7   : > { %1600 = vmatpush1.bf16.msra.mxu0 %v3435_v11  ;;  %3097 = vmatpush3.bf16.msra.mxu1 %v3449_v43  ;;  %vm1410_vm1 = vmand %vm1399_vm0, %vm1408_vm11 }
 0x3b8   : > { %1601 = vmatprep.subr.bf16.mxu0 %v3436_v12  ;;  %3098 = vmatprep.subr.bf16.mxu1 %v4096_v26  ;;  %v1412_v59 = vsel %vm1410_vm1, 0.0, %v4099_v54 }
 0x3ba   : > { %p2983_p10 = scmp.ne.s32.totalorder %s5039_s25, 1 }
 0x3bb   : > { %1602 = vmatpush1.bf16.msra.mxu0 %v3438_v15  ;;  %3099 = vmatpush3.bf16.msra.mxu1 %v3450_v44 }
 0x3bc   : > { %1603 = vmatprep.subr.bf16.mxu0 %v3439_v17  ;;  %3100 = vmatprep.subr.bf16.mxu1 %v4096_v26 }
 0x3bf   : > { %1604 = vmatpush1.bf16.msra.mxu0 %v3441_v18  ;;  %3101 = vmatpush3.bf16.msra.mxu1 %v3451_v45 }
 0x3c0   : > { %1605 = vmatprep.subr.bf16.mxu0 %v3442_v19  ;;  %3102 = vmatprep.subr.bf16.mxu1 %v4096_v26 }
 0x3c3   : > { %1606 = vmatpush1.bf16.msra.mxu0 %v3444_v20  ;;  %3103 = vmatpush3.bf16.msra.mxu1 %v3452_v46  ;;  %v1460_v20 = vsub.s32 2, %v4735_v8 }
 0x3c4   : > { %1607 = vmatprep.subr.bf16.mxu0 %v3445_v21  ;;  %3104 = vmatprep.subr.bf16.mxu1 %v4096_v26 }
 0x3c7   : > { %1608 = vmatpush1.bf16.msra.mxu0 %v3447_v22  ;;  %3105 = vmatpush3.bf16.msra.mxu1 %v3453_v47  ;;  %v1461_v22 = vrot.slane %v4767_v29, %v1460_v20 }
 0x3c8   : > { %3114 = vmatprep.subr.bf16.mxu0 %v4096_v26  ;;  %3106 = vmatprep.subr.bf16.mxu1 %v4096_v26 }
 0x3ca   : > { %1626 = vmatmul.mubr.bf16.vlgmr.msra.gmra.mxu0 %v1415_v25 }
 0x3cb   : > { %3116 = vmatprep.mubr.msk.bf16.mxu0 %vm4097_vm9, %v4096_v26  ;;  %3107 = vmatpush3.bf16.msra.mxu1 %v3454_v48 }
 0x3cc   : > { %3108 = vmatprep.subr.bf16.mxu1 %v4096_v26 }
 0x3cf   : > { %3109 = vmatpush3.bf16.msra.mxu1 %v3455_v49 }
 0x3d0   : > { %3120 = vmatprep.subr.bf16.mxu1 %v4096_v26 }
 0x3d2   : > { %3111 = vmatmul.mubr.bf16.vlgmr.msra.gmra.mxu1 %v1415_v25 }
 0x3d3   : > { %3122 = vmatprep.mubr.msk.bf16.mxu1 %vm4097_vm9, %v4096_v26 }
 0x48a   : > { %v1627_v28 = vpop.f32.mrf.mxu0 }
 0x48b   : > { %v1628_v39 = vadd.f32 %v1627_v28, %v1453_v34 }
 0x48c   : > { %v1629_v30 = vpop.f32.mrf.mxu0 }
 0x48d   : > { %v1630_v35 = vadd.f32 %v1629_v30, %v1457_v31 }
 0x48e   : > { %v1631_v32 = vpop.f32.mrf.mxu0 }
 0x48f   : > { %v1632_v37 = vadd.f32 %v1631_v32, %v1453_v34 }
 0x490   : > { %v1633_v33 = vpop.f32.mrf.mxu0 }
 0x491   : > { %v1634_v36 = vadd.f32 %v1633_v33, %v1457_v31  ;;  %v1677_v41 = vpack.c.bf16 %v1632_v37, %v1628_v39 }
 0x492   : > { %v1670_v21 = vpop.f32.mrf.mxu1 }
 0x493   : > { %v1678_v38 = vpack.c.bf16 %v1634_v36, %v1630_v35  ;;  %v1671_v27 = vadd.f32 %v1670_v21, %v1461_v22  ;;  %v3458_v21 = vld [vmem:[%s4654_s4 + $0x38] sm:$0xff]  }
 0x494   : > { %v3112_v25 = vpop.f32.mrf.mxu1 }
 0x495   : > { %1799 = vrot.lane.b32.xlu0 %v1678_v38, %s4098_s19  ;;  %v1685_v40 = vsel %vm1680_vm10, %v1678_v38, 0  ;;  %v3462_v25 = vld [vmem:[%s4654_s4 + $0x18] sm:$0xff]  }
 0x496   : > { %3115 = vmatpush3.bf16.xpose.msra.mxu0 %v1685_v40  ;;  %v1673_v28 = vpop.f32.mrf.mxu1 }
 0x497   : > { %3126 = vmatprep.subr.bf16.mxu0 %v4096_v26  ;;  %v1674_v30 = vadd.f32 %v1673_v28, %v1461_v22  ;;  %v3460_v22 = vld [vmem:[%s4654_s4 + $0x28] sm:$0xff]  }
 0x498   : > { %v3113_v31 = vpop.f32.mrf.mxu1  ;;  %v3464_v28 = vld [vmem:[%s4654_s4 + $0x8] sm:$0xff]  }
 0x499   : > { %1796 = vrot.lane.b32.xlu0 %v1677_v41, %s4098_s19  ;;  %v1679_v32 = vpack.c.bf16 %v1674_v30, %v1671_v27  ;;  %v3463_v27 = vld [vmem:[%s4654_s4 + $0x10] sm:$0xff]   ;;  %v3465_v30 = vld [vmem:[%s4654_s4] sm:$0xff]  }
 0x49b   : > { %3121 = vmatpush3.bf16.msra.mxu1 %v1679_v32 }
 0x49c   : > { %3132 = vmatprep.subr.bf16.mxu1 %v4096_v26 }
 0x49d   : > { %3117 = vmatmul.mubr.msk.bf16.vlgmr.msra.gmra.mxu0 %vm1680_vm10, %v1677_v41 }
 0x49e   : > { %3128 = vmatprep.mubr.msk.bf16.mxu0 %vm4097_vm9, %v4096_v26 }
 0x507   : > { %v1800_v50 = vpop.permute.xlu0 %1799 }
 0x508   : > { %v1805_v51 = vsel %vm1680_vm10, %v1800_v50, 0 }
 0x509   : > { %3127 = vmatpush3.bf16.xpose.msra.mxu0 %v1805_v51 }
 0x50a   : > { %3138 = vmatprep.subr.bf16.mxu0 %v4096_v26 }
 0x50b   : > { %v1797_v52 = vpop.permute.xlu0 %1796 }
 0x510   : > { %3129 = vmatmul.mubr.msk.bf16.vlgmr.msra.gmra.mxu0 %vm1680_vm10, %v1797_v52 }
 0x511   : > { %3142 = vmatprep.mubr.msk.bf16.mxu0 %vm4097_vm9, %v4096_v26 }
 0x55d   : > { %v1721_v56 = vpop.f32.mrf.mxu0 }
 0x55e   : > { %v1722_v57 = vadd.f32 %v1721_v56, %v1411_v55  ;;  %v3456_v56 = vld [vmem:[%s4649_s24 + $0x8] sm:$0xff]  }
 0x55f   : > { %v3118_v58 = vpop.f32.mrf.mxu0  ;;  %3139 = vmatpush3.bf16.msra.mxu0 %v3456_v56  ;;  %v3466_v56 = vld [vmem:[%s4657_s29 + $0x38] sm:$0xff]  }
 0x560   : > { %v1728_v60 = vsel %vm1680_vm10, %v1722_v57, -inf  ;;  %3140 = vmatprep.subr.bf16.mxu0 %v4096_v26 }
 0x561   : > { %v1724_v61 = vpop.f32.mrf.mxu0  ;;  %1729 = vmax.xlane.f32.xlu1 %v1728_v60 }
 0x562   : > { %v1725_v62 = vadd.f32 %v1724_v61, %v1412_v59  ;;  %v3457_v61 = vld [vmem:[%s4649_s24] sm:$0xff]   ;;  %s5034_s24 = scalar_lea.vmem [#allocation12], %s4638_s20 }
 0x563   : > { %v3119_v63 = vpop.f32.mrf.mxu0  ;;  %3141 = vmatpush3.bf16.msra.mxu0 %v3457_v61  ;;  %v3471_v61 = vld [vmem:[%s4657_s29 + $0x10] sm:$0xff]  }
 0x564   : > { %v1731_v0 = vsel %vm1680_vm10, %v1725_v62, -inf  ;;  %3166 = vmatprep.subr.bf16.mxu0 %v4096_v26 }
 0x565   : > { %1732 = vmax.xlane.f32.xlu1 %v1731_v0 }
 0x5d0   : > { %v1841_v1 = vpop.f32.mrf.mxu0 }
 0x5d1   : > { %v1842_v2 = vadd.f32 %v1841_v1, %v1411_v55 }
 0x5d2   : > { %v3130_v3 = vpop.f32.mrf.mxu0 }
 0x5d3   : > { %v1848_v4 = vsel %vm1680_vm10, %v1842_v2, -inf }
 0x5d4   : > { %v1844_v5 = vpop.f32.mrf.mxu0  ;;  %1849 = vmax.xlane.f32.xlu0 %v1848_v4 }
 0x5d5   : > { %v1845_v6 = vadd.f32 %v1844_v5, %v1412_v59 }
 0x5d6   : > { %v3131_v7 = vpop.f32.mrf.mxu0 }
 0x5d7   : > { %v1851_v9 = vsel %vm1680_vm10, %v1845_v6, -inf }
 0x5d8   : > { %1852 = vmax.xlane.f32.xlu1 %v1851_v9 }
 0x5ea   : > { %v1730_v10 = vpop.xlane.xlu1 %1729 }
 0x5eb   : > { %v1734_v11 = vsub.f32 %v1722_v57, %v1730_v10  ;;  %v2957_v10 = vld [vmem:[%s975_s22] ss:$0 sm:$0xff]  ;;  %s5035_s22 = scalar_lea.vmem [#allocation14], %s4638_s20 }
 0x5ed   : > { %v1736_v12 = vmul.f32 1.442695, %v1734_v11 }
 0x5ee   : > { %v1733_v13 = vpop.xlane.xlu1 %1732 }
 0x5ef   : > { %3474 = vpow2.f32 %v1736_v12  ;;  %v1735_v14 = vsub.f32 %v1725_v62, %v1733_v13 }
 0x5f1   : > { %v1738_v15 = vmul.f32 1.442695, %v1735_v14 }
 0x5f3   : > { %3476 = vpow2.f32 %v1738_v15 }
 0x5fc   : > { %v3475_v16 = vpop.eup %3474 }
 0x5fd   : > { %v1740_v17 = vsel %vm1680_vm10, %v3475_v16, 0.0 }
 0x5fe   : > { %1741 = vadd.xlane.f32.xlu1 %v1740_v17 }
 0x600   : > { %v3477_v18 = vpop.eup %3476 }
 0x601   : > { %v1743_v19 = vsel %vm1680_vm10, %v3477_v18, 0.0 }
 0x602   : > { %1744 = vadd.xlane.f32.xlu1 %v1743_v19 }
 0x65d   : > { %v1850_v33 = vpop.xlane.xlu0 %1849 }
 0x65e   : > { %v1854_v34 = vsub.f32 %v1842_v2, %v1850_v33 }
 0x660   : > { %v1856_v35 = vmul.f32 1.442695, %v1854_v34 }
 0x661   : > { %v1853_v36 = vpop.xlane.xlu1 %1852 }
 0x662   : > { %3478 = vpow2.f32 %v1856_v35  ;;  %v1855_v37 = vsub.f32 %v1845_v6, %v1853_v36 }
 0x664   : > { %v1858_v38 = vmul.f32 1.442695, %v1855_v37 }
 0x666   : > { %3480 = vpow2.f32 %v1858_v38 }
 0x66f   : > { %v3479_v8 = vpop.eup %3478 }
 0x670   : > { %v1860_v29 = vsel %vm1680_vm10, %v3479_v8, 0.0 }
 0x671   : > { %1861 = vadd.xlane.f32.xlu1 %v1860_v29 }
 0x673   : > { %v3481_v39 = vpop.eup %3480 }
 0x674   : > { %v1863_v40 = vsel %vm1680_vm10, %v3481_v39, 0.0 }
 0x675   : > { %1864 = vadd.xlane.f32.xlu1 %v1863_v40 }
 0x686   : > { %1872 = vrot.lane.b32.xlu1 %v1679_v32, %s4098_s19 }
 0x687   : > { %v1742_v41 = vpop.xlane.xlu1 %1741 }
 0x688   : > { %3482 = vrcp.f32 %v1742_v41 }
 0x68b   : > { %v1745_v42 = vpop.xlane.xlu1 %1744 }
 0x68c   : > { %3484 = vrcp.f32 %v1745_v42 }
 0x695   : > { %v3483_v43 = vpop.eup %3482 }
 0x696   : > { %v1748_v45 = vmul.f32 %v3483_v43, %v3475_v16 }
 0x699   : > { %v3485_v44 = vpop.eup %3484 }
 0x69a   : > { %v1749_v46 = vmul.f32 %v3485_v44, %v3477_v18 }
 0x69c   : > { %v1750_v47 = vpack.c.bf16 %v1749_v46, %v1748_v45  ;;  %v2961_v46 = vld [vmem:[%s983_s26] ss:$0 sm:$0xff]  ;;  %s5036_s26 = scalar_lea.vmem [#allocation16], %s4638_s20 }
 0x69e   : > { %3123 = vmatmul.mubr.msk.bf16.vlgmr.msra.gmra.mxu1 %vm1680_vm10, %v1750_v47 }
 0x69f   : > { %3134 = vmatprep.mubr.msk.bf16.mxu1 %vm4097_vm9, %v4096_v26 }
 0x6fa   : > { %v1862_v48 = vpop.xlane.xlu1 %1861 }
 0x6fb   : > { %3486 = vrcp.f32 %v1862_v48 }
 0x6fe   : > { %v1865_v49 = vpop.xlane.xlu1 %1864 }
 0x6ff   : > { %3488 = vrcp.f32 %v1865_v49 }
 0x702   : > { %v1873_v50 = vpop.permute.xlu1 %1872 }
 0x703   : > { %3133 = vmatpush3.bf16.msra.mxu1 %v1873_v50 }
 0x704   : > { %3146 = vmatprep.subr.bf16.mxu1 %v4096_v26 }
 0x708   : > { %v3487_v51 = vpop.eup %3486 }
 0x709   : > { %v1868_v53 = vmul.f32 %v3487_v51, %v3479_v8  ;;  %v2962_v51 = vld [vmem:[%s5034_s24] ss:$0 sm:$0xff] }
 0x70c   : > { %v3489_v52 = vpop.eup %3488 }
 0x70d   : > { %v1869_v54 = vmul.f32 %v3489_v52, %v3481_v39 }
 0x70f   : > { %v1870_v55 = vpack.c.bf16 %v1869_v54, %v1868_v53 }
 0x711   : > { %3135 = vmatmul.mubr.msk.bf16.vlgmr.msra.gmra.mxu1 %vm1680_vm10, %v1870_v55 }
 0x712   : > { %3162 = vmatprep.mubr.msk.bf16.mxu1 %vm4097_vm9, %v4096_v26  ;;  %3147 = vmatpush3.bf16.msra.mxu1 %v3458_v21 }
 0x713   : > { %3148 = vmatprep.subr.bf16.mxu1 %v4096_v26 }
 0x75e   : > { %v1788_v57 = vpop.f32.mrf.mxu1 }
 0x760   : > { %v3124_v58 = vpop.f32.mrf.mxu1 }
 0x761   : > { %v3468_v58 = vld [vmem:[%s4657_s29 + $0x28] sm:$0xff]  }
 0x762   : > { %v1791_v59 = vpop.f32.mrf.mxu1 }
 0x764   : > { %v3125_v60 = vpop.f32.mrf.mxu1 }
 0x765   : > { %v3470_v60 = vld [vmem:[%s4657_s29 + $0x18] sm:$0xff]  }
 0x7d1   : > { %v1912_v62 = vpop.f32.mrf.mxu1 }
 0x7d3   : > { %v3136_v63 = vpop.f32.mrf.mxu1 }
 0x7d4   : > { %v3473_v63 = vld [vmem:[%s4657_s29] sm:$0xff]  }
 0x7d5   : > { %v1915_v0 = vpop.f32.mrf.mxu1 }
 0x7d6   : > { %v3419_v1 = vpack.i.bf16 %v1915_v0, %v1912_v62  ;;  %v3472_v62 = vld [vmem:[%s4657_s29 + $0x8] sm:$0xff]   ;;  %v2963_v0 = vld [vmem:[%s5035_s22] ss:$0 sm:$0xff] }
 0x7d7   : > { %v3137_v2 = vpop.f32.mrf.mxu1 }
 0x7d8   : > { %3420 = vrot.lane.b32.xlu0 %v3419_v1, %s4100_s2 }
 0x84a   : > { %v3421_v3 = vpop.permute.xlu0 %3420 }
 0x84b   : > { %v3423_v4 = vunpack.i.h.bf16 %v3421_v3  ;;  %v3422_v5 = vunpack.i.l.bf16 %v3421_v3 }
 0x84d   : > { %v1928_v6 = vsel %vm1680_vm10, %v1791_v59, %v3423_v4  ;;  %v1927_v7 = vsel %vm1680_vm10, %v1788_v57, %v3422_v5  ;;  %v3467_v57 = vld [vmem:[%s4657_s29 + $0x30] sm:$0xff]   ;;  %v3469_v59 = vld [vmem:[%s4657_s29 + $0x20] sm:$0xff]   ;;  %s5038_s29 = scalar_lea.vmem [#allocation18], %s4638_s20 }
 0x84e   : > { %v1929_v9 = vpack.c.bf16 %v1928_v6, %v1927_v7 }
 0x850   : > { %3143 = vmatmul.mubr.msk.bf16.vlgmr.msra.gmra.mxu0 %vm1953_vm2, %v1929_v9 }
 0x851   : > { %3182 = vmatprep.mubr.msk.bf16.mxu0 %vm4097_vm9, %v4096_v26  ;;  %3167 = vmatpush3.bf16.msra.mxu0 %v3466_v56 }
 0x852   : > { %3168 = vmatprep.subr.bf16.mxu0 %v4096_v26 }
 0x855   : > { %3169 = vmatpush3.bf16.msra.mxu0 %v3467_v57 }
 0x856   : > { %3170 = vmatprep.subr.bf16.mxu0 %v4096_v26 }
 0x859   : > { %3171 = vmatpush3.bf16.msra.mxu0 %v3468_v58 }
 0x85a   : > { %3172 = vmatprep.subr.bf16.mxu0 %v4096_v26 }
 0x85d   : > { %3173 = vmatpush3.bf16.msra.mxu0 %v3469_v59 }
 0x85e   : > { %3174 = vmatprep.subr.bf16.mxu0 %v4096_v26 }
 0x861   : > { %3175 = vmatpush3.bf16.msra.mxu0 %v3470_v60 }
 0x862   : > { %3176 = vmatprep.subr.bf16.mxu0 %v4096_v26 }
 0x865   : > { %3177 = vmatpush3.bf16.msra.mxu0 %v3471_v61 }
 0x866   : > { %3178 = vmatprep.subr.bf16.mxu0 %v4096_v26 }
 0x869   : > { %3179 = vmatpush3.bf16.msra.mxu0 %v3472_v62 }
 0x86a   : > { %3180 = vmatprep.subr.bf16.mxu0 %v4096_v26 }
 0x86d   : > { %3181 = vmatpush3.bf16.msra.mxu0 %v3473_v63 }
 0x910   : > { %v1991_v11 = vpop.f32.mrf.mxu0 }
 0x911   : > { %v1992_v12 = vadd.f32 %v2957_v10, %v1991_v11 }
 0x912   : > { %v3144_v13 = vpop.f32.mrf.mxu0 }
 0x913   : > { %v1998_v14 = vadd.f32 %v1992_v12, %v4753_v23  ;;  %v3459_v23 = vld [vmem:[%s4654_s4 + $0x30] sm:$0xff]  }
 0x914   : > { %v1994_v15 = vpop.f32.mrf.mxu0  ;;  %3149 = vmatpush3.bf16.msra.mxu1 %v3459_v23 }
 0x915   : > { %v1995_v16 = vadd.f32 %v2957_v10, %v1994_v15  ;;  %2002 = vadd.xlane.f32.xlu1 %v1998_v14  ;;  %v2008_v19 = vmul.f32 %v1998_v14, %v1998_v14  ;;  %3150 = vmatprep.subr.bf16.mxu1 %v4096_v26 }
 0x916   : > { %v3145_v17 = vpop.f32.mrf.mxu0 }
 0x917   : > { %v1999_v18 = vadd.f32 %v1995_v16, %v4755_v24  ;;  %v3461_v24 = vld [vmem:[%s4654_s4 + $0x20] sm:$0xff]   ;;  %s5037_s4 = scalar_lea.vmem [#allocation17], %s4638_s20 }
 0x918   : > { %3151 = vmatpush3.bf16.msra.mxu1 %v3460_v22 }
 0x919   : > { %2010 = vadd.xlane.f32.xlu1 %v2008_v19  ;;  %2004 = vadd.xlane.f32.xlu0 %v1999_v18  ;;  %v2009_v20 = vmul.f32 %v1999_v18, %v1999_v18 }
 0x91a   : > { %3152 = vmatprep.subr.bf16.mxu1 %v4096_v26 }
 0x91c   : > { %3153 = vmatpush3.bf16.msra.mxu1 %v3461_v24 }
 0x91d   : > { %2012 = vadd.xlane.f32.xlu1 %v2009_v20  ;;  %3154 = vmatprep.subr.bf16.mxu1 %v4096_v26 }
 0x920   : > { %3155 = vmatpush3.bf16.msra.mxu1 %v3462_v25 }
 0x921   : > { %3156 = vmatprep.subr.bf16.mxu1 %v4096_v26 }
 0x924   : > { %3157 = vmatpush3.bf16.msra.mxu1 %v3463_v27  ;;  %v2972_v27 = vld [vmem:[%s5036_s26] ss:$0 sm:$0xff] }
 0x925   : > { %3158 = vmatprep.subr.bf16.mxu1 %v4096_v26 }
 0x928   : > { %3159 = vmatpush3.bf16.msra.mxu1 %v3464_v28 }
 0x929   : > { %3160 = vmatprep.subr.bf16.mxu1 %v4096_v26 }
 0x92c   : > { %3161 = vmatpush3.bf16.msra.mxu1 %v3465_v30 }
 0x99e   : > { %v2003_v31 = vpop.xlane.xlu1 %2002 }
 0x99f   : > { %v2006_v32 = vmul.f32 0.03125, %v2003_v31 }
 0x9a1   : > { %v2016_v35 = vmul.f32 %v2006_v32, %v2006_v32  ;;  %v2020_v43 = vsub.f32 %v1998_v14, %v2006_v32 }
 0x9a2   : > { %v2011_v33 = vpop.xlane.xlu1 %2010  ;;  %v2005_v34 = vpop.xlane.xlu0 %2004 }
 0x9a3   : > { %v2014_v36 = vmul.f32 0.03125, %v2011_v33  ;;  %v2007_v37 = vmul.f32 0.03125, %v2005_v34 }
 0x9a5   : > { %v2018_v38 = vsub.f32 %v2014_v36, %v2016_v35  ;;  %v2017_v39 = vmul.f32 %v2007_v37, %v2007_v37  ;;  %v2021_v47 = vsub.f32 %v1999_v18, %v2007_v37 }
 0x9a6   : > { %v2013_v8 = vpop.xlane.xlu1 %2012 }
 0x9a7   : > { %v2022_v29 = vadd.f32 1e-12, %v2018_v38  ;;  %v2015_v40 = vmul.f32 0.03125, %v2013_v8 }
 0x9a9   : > { %3490 = vrsqrt.f32 %v2022_v29  ;;  %v2019_v41 = vsub.f32 %v2015_v40, %v2017_v39 }
 0x9ab   : > { %v2023_v42 = vadd.f32 1e-12, %v2019_v41 }
 0x9ad   : > { %3492 = vrsqrt.f32 %v2023_v42 }
 0x9b6   : > { %v3491_v44 = vpop.eup %3490 }
 0x9b7   : > { %v2026_v45 = vmul.f32 %v3491_v44, %v2020_v43 }
 0x9b9   : > { %v2034_v50 = vmul.f32 %v2961_v46, %v2026_v45 }
 0x9ba   : > { %v3493_v48 = vpop.eup %3492 }
 0x9bb   : > { %v2027_v49 = vmul.f32 %v3493_v48, %v2021_v47  ;;  %v2042_v53 = vadd.f32 %v2962_v51, %v2034_v50 }
 0x9bd   : > { %v2035_v52 = vmul.f32 %v2961_v46, %v2027_v49 }
 0x9bf   : > { %v4853_v54 = vadd.f32 %v2962_v51, %v2035_v52 }
 0x9c1   : > { %v2044_v55 = vpack.c.bf16 %v4853_v54, %v2042_v53 }
 0x9c3   : > { %3163 = vmatmul.mubr.bf16.vlgmr.msra.gmra.mxu1 %v2044_v55  ;;  %v2982_v55 = vld [vmem:[%s5038_s29] ss:$0 sm:$0xff] }
 0xa83   : > { %v2150_v1 = vpop.f32.mrf.mxu1 }
 0xa84   : > { %v2151_v2 = vadd.f32 %v2963_v0, %v2150_v1 }
 0xa85   : > { %v3164_v3 = vpop.f32.mrf.mxu1 }
 0xa86   : > { %v2159_v4 = vmul.f32 0.044715, %v2151_v2  ;;  %v2157_v20 = vmul.f32 0.5, %v2151_v2 }
 0xa87   : > { %v2153_v5 = vpop.f32.mrf.mxu1 }
 0xa88   : > { %v2161_v6 = vmul.f32 %v2159_v4, %v2151_v2  ;;  %v2154_v7 = vadd.f32 %v2963_v0, %v2153_v5 }
 0xa89   : > { %v3165_v9 = vpop.f32.mrf.mxu1 }
 0xa8a   : > { %v2163_v10 = vmul.f32 %v2161_v6, %v2151_v2  ;;  %v2160_v11 = vmul.f32 0.044715, %v2154_v7  ;;  %v2158_v21 = vmul.f32 0.5, %v2154_v7 }
 0xa8c   : > { %v2165_v12 = vadd.f32 %v2163_v10, %v2151_v2  ;;  %v2162_v13 = vmul.f32 %v2160_v11, %v2154_v7 }
 0xa8e   : > { %v2167_v14 = vmul.f32 0.7978846, %v2165_v12  ;;  %v2164_v15 = vmul.f32 %v2162_v13, %v2154_v7 }
 0xa90   : > { %3494 = vtanh.f32 %v2167_v14  ;;  %v2166_v26 = vadd.f32 %v2164_v15, %v2154_v7 }
 0xa92   : > { %v2168_v16 = vmul.f32 0.7978846, %v2166_v26 }
 0xa94   : > { %3496 = vtanh.f32 %v2168_v16 }
 0xa9d   : > { %v3495_v17 = vpop.eup %3494 }
 0xa9e   : > { %v2171_v18 = vadd.f32 1.0, %v3495_v17 }
 0xaa0   : > { %v2173_v22 = vmul.f32 %v2171_v18, %v2157_v20 }
 0xaa1   : > { %v3497_v19 = vpop.eup %3496 }
 0xaa2   : > { %v2172_v23 = vadd.f32 1.0, %v3497_v19 }
 0xaa4   : > { %v2174_v24 = vmul.f32 %v2172_v23, %v2158_v21 }
 0xaa6   : > { %v2175_v25 = vpack.c.bf16 %v2174_v24, %v2173_v22 }
 0xaa8   : > { %3183 = vmatmul.mubr.bf16.vlgmr.msra.gmra.mxu0 %v2175_v25 }
 0xb68   : > { %v2281_v28 = vpop.f32.mrf.mxu0 }
 0xb69   : > { %v2282_v30 = vadd.f32 %v2972_v27, %v2281_v28 }
 0xb6a   : > { %v3184_v31 = vpop.f32.mrf.mxu0 }
 0xb6b   : > { %v2288_v32 = vadd.f32 %v2282_v30, %v2042_v53  ;;  %v2981_v53 = vld [vmem:[%s5037_s4] ss:$0 sm:$0xff] }
 0xb6c   : > { %v2284_v33 = vpop.f32.mrf.mxu0 }
 0xb6d   : > { %v2285_v34 = vadd.f32 %v2972_v27, %v2284_v33  ;;  %2292 = vadd.xlane.f32.xlu1 %v2288_v32  ;;  %v2298_v37 = vmul.f32 %v2288_v32, %v2288_v32 }
 0xb6e   : > { %v3185_v35 = vpop.f32.mrf.mxu0 }
 0xb6f   : > { %v2289_v36 = vadd.f32 %v2285_v34, %v4853_v54 }
 0xb71   : > { %2300 = vadd.xlane.f32.xlu1 %v2298_v37  ;;  %2294 = vadd.xlane.f32.xlu0 %v2289_v36  ;;  %v2299_v38 = vmul.f32 %v2289_v36, %v2289_v36 }
 0xb75   : > { %2302 = vadd.xlane.f32.xlu0 %v2299_v38 }
 0xbf6   : > { %v2293_v8 = vpop.xlane.xlu1 %2292 }
 0xbf7   : > { %v2296_v29 = vmul.f32 0.03125, %v2293_v8 }
 0xbf9   : > { %v2306_v41 = vmul.f32 %v2296_v29, %v2296_v29  ;;  %v2310_v51 = vsub.f32 %v2288_v32, %v2296_v29 }
 0xbfa   : > { %v2301_v39 = vpop.xlane.xlu1 %2300  ;;  %v2295_v40 = vpop.xlane.xlu0 %2294 }
 0xbfb   : > { %v2304_v42 = vmul.f32 0.03125, %v2301_v39  ;;  %v2297_v43 = vmul.f32 0.03125, %v2295_v40 }
 0xbfd   : > { %v2308_v44 = vsub.f32 %v2304_v42, %v2306_v41  ;;  %v2307_v47 = vmul.f32 %v2297_v43, %v2297_v43  ;;  %v2311_v57 = vsub.f32 %v2289_v36, %v2297_v43 }
 0xbfe   : > { %v2303_v45 = vpop.xlane.xlu0 %2302 }
 0xbff   : > { %v2312_v46 = vadd.f32 1e-12, %v2308_v44  ;;  %v2305_v48 = vmul.f32 0.03125, %v2303_v45 }
 0xc01   : > { %3498 = vrsqrt.f32 %v2312_v46  ;;  %v2309_v49 = vsub.f32 %v2305_v48, %v2307_v47 }
 0xc03   : > { %v2313_v50 = vadd.f32 1e-12, %v2309_v49 }
 0xc05   : > { %3500 = vrsqrt.f32 %v2313_v50 }
 0xc0e   : > { %v3499_v52 = vpop.eup %3498 }
 0xc0f   : > { %v2316_v54 = vmul.f32 %v3499_v52, %v2310_v51 }
 0xc11   : > { %v2324_v56 = vmul.f32 %v2981_v53, %v2316_v54 }
 0xc12   : > { %v3501_v58 = vpop.eup %3500 }
 0xc13   : > { %v2332_v59 = vadd.f32 %v2982_v55, %v2324_v56  ;;  %v2317_v60 = vmul.f32 %v3501_v58, %v2311_v57 }
 0xc15   : > { %2334 = vst [vmem:[#allocation2] sm:$0xff] %v2332_v59  ;;  %v2325_v61 = vmul.f32 %v2981_v53, %v2317_v60  ;;  %2339 = sbr.rel (%p2983_p10) target bundleno = 3541 (0xdd5), region = 192 }
 0xc17   : > { %v2333_v62 = vadd.f32 %v2982_v55, %v2325_v61 }
 0xc19   : > { %2335 = vst [vmem:[#allocation2 + $0x8] sm:$0xff] %v2333_v62 }
 0xc1a   : > { %v3502_v63 = vld [vmem:[#allocation19 + $0x38] sm:$0xff]   ;;  %v4101_v0 = vmov 0.0   ;;  %v3503_v1 = vld [vmem:[#allocation19 + $0x30] sm:$0xff]   ;;  %vm4102_vm3 = vmmov 0   ;;  %v3504_v2 = vld [vmem:[#allocation19 + $0x28] sm:$0xff]   ;;  %v2341_v11 = vrot.slane %v2333_v62, 7 }
 0xc1b   : > { %3186 = vmatprep.subr.bf16.mxu0 %v4101_v0  ;;  %3206 = vmatprep.subr.bf16.mxu1 %v4101_v0  ;;  %v3510_v3 = vld [vmem:[#allocation22 + $0x38] sm:$0xff]   ;;  %v3511_v5 = vld [vmem:[#allocation22 + $0x30] sm:$0xff]   ;;  %v3512_v7 = vld [vmem:[#allocation22 + $0x28] sm:$0xff]   ;;  %vm2343_vm4 = vcmask 1040384  }
 0xc1c   : > { %3187 = vmatpush3.bf16.msra.mxu0 %v3502_v63  ;;  %3202 = vmatprep.mubr.msk.bf16.mxu0 %vm4102_vm3, %v4101_v0  ;;  %v3505_v4 = vld [vmem:[#allocation19 + $0x20] sm:$0xff]   ;;  %v3506_v6 = vld [vmem:[#allocation19 + $0x18] sm:$0xff]   ;;  %v3507_v9 = vld [vmem:[#allocation19 + $0x10] sm:$0xff]   ;;  %v2344_v13 = vsel %vm2343_vm4, %v2332_v59, %v2341_v11 }
 0xc1d   : > { %3188 = vmatprep.subr.bf16.mxu0 %v4101_v0  ;;  %3222 = vmatprep.mubr.msk.bf16.mxu1 %vm4102_vm3, %v4101_v0  ;;  %v3508_v10 = vld [vmem:[#allocation19 + $0x8] sm:$0xff]   ;;  %v3509_v12 = vld [vmem:[#allocation19] sm:$0xff]   ;;  %v2345_v14 = vpack.c.bf16 %v2344_v13, %v2344_v13  ;;  %v3515_v16 = vld [vmem:[#allocation22 + $0x10] sm:$0xff]  }
 0xc1e   : > { %3207 = vmatpush3.bf16.msra.mxu1 %v3510_v3  ;;  %v3513_v15 = vld [vmem:[#allocation22 + $0x20] sm:$0xff]   ;;  %v3514_v26 = vld [vmem:[#allocation22 + $0x18] sm:$0xff]   ;;  %v3516_v17 = vld [vmem:[#allocation22 + $0x8] sm:$0xff]  }
 0xc1f   : > { %3208 = vmatprep.subr.bf16.mxu1 %v4101_v0  ;;  %v3517_v18 = vld [vmem:[#allocation22] sm:$0xff]   ;;  %v2984_v19 = vld [vmem:[#allocation20] ss:$0 sm:$0xff] }
 0xc20   : > { %3189 = vmatpush3.bf16.msra.mxu0 %v3503_v1  ;;  %v2993_v28 = vld [vmem:[#allocation23] ss:$0 sm:$0xff] }
 0xc21   : > { %3190 = vmatprep.subr.bf16.mxu0 %v4101_v0 }
 0xc22   : > { %3209 = vmatpush3.bf16.msra.mxu1 %v3511_v5 }
 0xc23   : > { %3210 = vmatprep.subr.bf16.mxu1 %v4101_v0 }
 0xc24   : > { %3191 = vmatpush3.bf16.msra.mxu0 %v3504_v2 }
 0xc25   : > { %3192 = vmatprep.subr.bf16.mxu0 %v4101_v0 }
 0xc26   : > { %3211 = vmatpush3.bf16.msra.mxu1 %v3512_v7 }
 0xc27   : > { %3212 = vmatprep.subr.bf16.mxu1 %v4101_v0 }
 0xc28   : > { %3193 = vmatpush3.bf16.msra.mxu0 %v3505_v4 }
 0xc29   : > { %3194 = vmatprep.subr.bf16.mxu0 %v4101_v0 }
 0xc2a   : > { %3213 = vmatpush3.bf16.msra.mxu1 %v3513_v15 }
 0xc2b   : > { %3214 = vmatprep.subr.bf16.mxu1 %v4101_v0 }
 0xc2c   : > { %3195 = vmatpush3.bf16.msra.mxu0 %v3506_v6 }
 0xc2d   : > { %3196 = vmatprep.subr.bf16.mxu0 %v4101_v0 }
 0xc2e   : > { %3215 = vmatpush3.bf16.msra.mxu1 %v3514_v26 }
 0xc2f   : > { %3216 = vmatprep.subr.bf16.mxu1 %v4101_v0 }
 0xc30   : > { %3197 = vmatpush3.bf16.msra.mxu0 %v3507_v9 }
 0xc31   : > { %3198 = vmatprep.subr.bf16.mxu0 %v4101_v0 }
 0xc32   : > { %3217 = vmatpush3.bf16.msra.mxu1 %v3515_v16 }
 0xc33   : > { %3218 = vmatprep.subr.bf16.mxu1 %v4101_v0 }
 0xc34   : > { %3199 = vmatpush3.bf16.msra.mxu0 %v3508_v10 }
 0xc35   : > { %3200 = vmatprep.subr.bf16.mxu0 %v4101_v0 }
 0xc36   : > { %3219 = vmatpush3.bf16.msra.mxu1 %v3516_v17 }
 0xc37   : > { %3220 = vmatprep.subr.bf16.mxu1 %v4101_v0 }
 0xc38   : > { %3201 = vmatpush3.bf16.msra.mxu0 %v3509_v12 }
 0xc3a   : > { %3221 = vmatpush3.bf16.msra.mxu1 %v3517_v18 }
 0xc3b   : > { %3203 = vmatmul.mubr.bf16.vlgmr.msra.gmra.mxu0 %v2345_v14 }
 0xcfb   : > { %v2451_v20 = vpop.f32.mrf.mxu0 }
 0xcfc   : > { %v2452_v21 = vadd.f32 %v2984_v19, %v2451_v20 }
 0xcfd   : > { %v3204_v23 = vpop.f32.mrf.mxu0 }
 0xcfe   : > { %3518 = vtanh.f32 %v2452_v21 }
 0xcff   : > { %v2454_v22 = vpop.f32.mrf.mxu0 }
 0xd01   : > { %v3205_v24 = vpop.f32.mrf.mxu0 }
 0xd0b   : > { %v3519_v25 = vpop.eup %3518 }
 0xd0c   : > { %v2458_v27 = vpack.c.bf16 %v3519_v25, %v3519_v25 }
 0xd0e   : > { %3223 = vmatmul.mubr.bf16.vlgmr.msra.gmra.mxu1 %v2458_v27 }
 0xdce   : > { %v2564_v30 = vpop.f32.mrf.mxu1 }
 0xdcf   : > { %v2565_v31 = vadd.f32 %v2993_v28, %v2564_v30 }
 0xdd0   : > { %v3224_v32 = vpop.f32.mrf.mxu1 }
 0xdd1   : > { %2570 = vst [vmem:[#allocation25] sm:$0x3] %v2565_v31 }
 0xdd2   : > { %v2567_v33 = vpop.f32.mrf.mxu1 }
 0xdd4   : > { %v3225_v34 = vpop.f32.mrf.mxu1 }
 0xdd5 PF: > { %s5040_s20 = sld [smem:[#allocation35_spill]]  ;;  %s4103_s0 = smov [#allocation25]  }
 0xdd6   : > { %s2578_s6 = sshll.u32 %s4103_s0, 4  ;;  %s2579_s6 = int_to_ptr.vmem [resolvable:$true] %s2578_s6 }
 0xdd7   : > { %s3984_s28 = scalar_lea.vmem %s2579_s6, 32  ;;  %p3991_p2 = scmp.lt.s32.totalorder %s2579_s6, %s2579_s6 }
 0xdd8   : > { %p3985_p12 = scmp.ne.s32.totalorder %s2579_s6, %s3984_s28  ;;  %p3992_p3 = scmp.lt.s32.totalorder %s3984_s28, %s3984_s28 }
 0xdda   : > { %p3993_p8 = por %p3992_p3, %p3991_p2 }
 0xddb   : > { %p3346_p5 = scmp.eq.s32.totalorder %s5040_s20, 1 }
 0xddd   : > { %p3986_p1 = pnand %p3985_p12, %p3346_p5 }
 0xddf   : > { %p3987_p13 = pneg %p3986_p1 }
 0xde1   : > { %p3994_p7 = pnand %p3993_p8, %p3987_p13 }
 0xde3   : > { %3997 = shalt.err (!%p3994_p7)
}
 0xde4   : > { %s5041_s8 = sld [smem:[#allocation56_spill]] }
 0xdea   : > { %3277 = dma.vmem_to_hbm [thread:$0]  (%p3346_p5), %s2579_s6, 32, %s5041_s8, [#allocation5]  }
 0xdeb   : > { %4049 = dma.done.wait (%p3346_p5), [#allocation5], 32  }
 0xdec   : > { %4051 = vsyncadd (%p3346_p5), [#allocation5], 4294967264 }
 0xded PF: > { %s5042_s28 = sld [smem:[#allocation36_spill]] }
 0xdee   : > { %s5043_s5 = sld [smem:[#allocation33_spill]] }
 0xdef   : > { %s5044_s26 = sld [smem:[#allocation34_spill]] }
 0xdf0   : > { %s5045_s27 = sld [smem:[#allocation37_spill]] }
 0xdf3   : > { %p36_p6 = scmp.ge.s32.totalorder %s5042_s28, 4  }
 0xdf5   :  { %38 = sbr.rel (!%p36_p6) target bundleno = 24 (0x18), region = 297 }
 0xdfa   :  { %2591 = vsyncpa [#allocation4], 1 }
 0xdfb   :  { %2593 = vsyncpa [#allocation4 + $0x1], 1 }
 0xdfc   :  { %2594 = vsyncpa [#allocation7], 1 }
 0xdfd   :  { %2595 = vsyncpa [#allocation21], 1 }
 0xdfe   :  { %2596 = vsyncpa [#allocation24], 1 }
 0xdff   :  { %2597 = vsyncpa [#allocation5], 1 }
 0xe00   :  { %2599 = vsyncpa [#allocation5 + $0x1], 1 }

</bundles_post_ra>
